<compile_context>
chip_gen: v7x
topology: tpu7x:2x2x1
jax: 0.10.0
libtpu: 0.0.40
codegen_flags: <defaults>
</compile_context>

<pallas_src>
import functools
import math

import jax
import jax.numpy as jnp
from jax.experimental import pallas as pl
from jax.experimental.pallas import tpu as pltpu


# ----------------------------------------------------------------------------- #
# Pallas kernel 1: conv-as-GEMM  (bf16 operands, f32 accumulate, lane-dense out)
# ----------------------------------------------------------------------------- #
def _matmul_bias_kernel(a_ref, w_ref, b_ref, o_ref):
    o_ref[...] = (jnp.dot(a_ref[...], w_ref[...],
                          preferred_element_type=jnp.float32)
                  + b_ref[...]).astype(o_ref.dtype)


def matmul_bias(a, w, b, *, tile_rows=256):
    """out = a @ w + b  (f32).  Rows are pair-packed so the stored slab is 128 wide."""
    M, K = a.shape
    Nc = w.shape[1]
    a = a.astype(jnp.bfloat16)
    w = w.astype(jnp.bfloat16)
    b = jnp.asarray(b, jnp.float32).reshape(1, Nc)

    # pack R consecutive output rows into one lane-dense (R*Nc)-wide stored row
    R = 128 // Nc if (Nc < 128 and 128 % Nc == 0) else 1
    # lane-align the contraction dim (zero rows of w contribute nothing)
    K_pad = pl.cdiv(K, 128) * 128
    if K_pad != K:
        a = jnp.pad(a, ((0, 0), (0, K_pad - K)))
        w = jnp.pad(w, ((0, K_pad - K), (0, 0)))

    M_r = pl.cdiv(M, R) * R
    if M_r != M:
        a = jnp.pad(a, ((0, M_r - M), (0, 0)))
    a2 = a.reshape(M_r // R, R * K_pad)                 # row r = [a[R*r] | ... | a[R*r+R-1]]
    w2 = jnp.kron(jnp.eye(R, dtype=w.dtype), w)         # block-diagonal (R*K_pad, R*Nc)
    b2 = jnp.tile(b, (1, R))                            # (1, R*Nc)

    M2 = M_r // R
    tm = tile_rows if M2 >= tile_rows else max(8, ((M2 + 7) // 8) * 8)
    M2_pad = pl.cdiv(M2, tm) * tm
    if M2_pad != M2:
        a2 = jnp.pad(a2, ((0, M2_pad - M2), (0, 0)))

    out2 = pl.pallas_call(
        _matmul_bias_kernel,
        out_shape=jax.ShapeDtypeStruct((M2_pad, R * Nc), jnp.float32),
        grid=(M2_pad // tm,),
        in_specs=[pl.BlockSpec((tm, R * K_pad), lambda i: (i, 0)),
                  pl.BlockSpec((R * K_pad, R * Nc), lambda i: (0, 0)),
                  pl.BlockSpec((1, R * Nc), lambda i: (0, 0))],
        out_specs=pl.BlockSpec((tm, R * Nc), lambda i: (i, 0)),
        compiler_params=pltpu.CompilerParams(
            dimension_semantics=("parallel",)),
    )(a2, w2, b2)
    return out2[:M2].reshape(M_r, Nc)[:M]


# ----------------------------------------------------------------------------- #
# Pallas kernel 2: token2map as one-hot MXU scatter-average (lane-packed output)
# ----------------------------------------------------------------------------- #
def _token2map_kernel(idx_hw_ref, idx_agg_ref, x_ref, o_ref, *, P):
    # idx_hw_ref : (1, 1, N0)   grid-cell id per original point   (row layout)
    # idx_agg_ref: (1, N0, 1)   source-token id per original point (column layout)
    # x_ref      : (1, N, C)    token features (f32)
    # o_ref      : (1, HW//P, C*P)  lane-packed feature map
    n0 = idx_hw_ref.shape[2]
    N = x_ref.shape[1]
    HWP = o_ref.shape[1]

    idx_hw = idx_hw_ref[0]                                             # (1, N0)
    idx_agg = idx_agg_ref[0]                                           # (N0, 1)
    x = x_ref[0]                                                       # (N, C)

    # gather token feature for every original point (one-hot GEMM on the MXU)
    n_iota = jax.lax.broadcasted_iota(jnp.int32, (n0, N), 1)
    oh_tok = (idx_agg == n_iota).astype(jnp.float32)                   # (N0, N)
    x_src = jnp.dot(oh_tok, x, preferred_element_type=jnp.float32)     # (N0, C)
    ones_col = jnp.ones((n0, 1), jnp.float32)

    # scatter-average onto the map; P consecutive cells packed per 128-lane row.
    parts = []
    for q in range(P):
        cell = jax.lax.broadcasted_iota(jnp.int32, (HWP, n0), 0) * P + q
        ohT = (cell == idx_hw).astype(jnp.float32)                     # (HW//P, N0)
        acc = jnp.dot(ohT, x_src, preferred_element_type=jnp.float32)  # (HW//P, C)
        cnt = jnp.dot(ohT, ones_col, preferred_element_type=jnp.float32)
        parts.append(acc / (cnt + 1e-6))
    res = parts[0] if P == 1 else jnp.concatenate(parts, axis=-1)
    o_ref[0] = res.astype(o_ref.dtype)


def token2map_pallas(x, idx_hw, idx_agg, H, W):
    # TODO(synk): at production sizes (N0, HW in the thousands) chunk the N0 axis of
    # the one-hot so the (N0, HW) intermediate stays within VMEM.
    B, N, C = x.shape
    N0 = idx_hw.shape[1]
    HW = H * W
    P = 128 // C if (C < 128 and 128 % C == 0 and HW % (128 // C) == 0) else 1
    out = pl.pallas_call(
        functools.partial(_token2map_kernel, P=P),
        out_shape=jax.ShapeDtypeStruct((B, HW // P, C * P), jnp.float32),
        grid=(B,),
        in_specs=[pl.BlockSpec((1, 1, N0), lambda bb: (bb, 0, 0)),
                  pl.BlockSpec((1, N0, 1), lambda bb: (bb, 0, 0)),
                  pl.BlockSpec((1, N, C), lambda bb: (bb, 0, 0))],
        out_specs=pl.BlockSpec((1, HW // P, C * P), lambda bb: (bb, 0, 0)),
        compiler_params=pltpu.CompilerParams(
            dimension_semantics=("parallel",)),
    )(idx_hw.reshape(B, 1, N0).astype(jnp.int32),
      idx_agg.reshape(B, N0, 1).astype(jnp.int32),
      x.astype(jnp.float32))
    return out.reshape(B, H, W, C)


# ----------------------------------------------------------------------------- #
# Pallas kernel 3: fused map2token gather + skip-linear + LayerNorm
#                  (row-pair packed 128-lane output; conf/exp done in wrapper)
# ----------------------------------------------------------------------------- #
def _fused_map2token_kernel(xmap_ref, idxhw_ref, idxagg_ref, aw_ref, xpk_ref,
                            ws_ref, g_ref, b_ref, o_ref, *, PAIR, eps=1e-5):
    n0 = idxhw_ref.shape[1]
    HW = xmap_ref.shape[1]
    Dout = xmap_ref.shape[2]
    C = ws_ref.shape[0]
    Np = xpk_ref.shape[1]                                              # N // PAIR

    xmap = xmap_ref[0]                                                 # (HW, Dout) f32
    idx_hw = idxhw_ref[0]                                              # (N0, 1) i32
    idx_agg = idxagg_ref[0]                                            # (1, N0) i32
    aw = aw_ref[0]                                                     # (N0, 1) f32
    xpk = xpk_ref[0]                                                   # (Np, PAIR*C) bf16
    ws = ws_ref[...]                                                   # (C, Dout) bf16
    g = g_ref[...]
    b = b_ref[...]

    # map2token gather (one-hot GEMM on the MXU)
    h_iota = jax.lax.broadcasted_iota(jnp.int32, (n0, HW), 1)
    oh_hw = (idx_hw == h_iota).astype(jnp.float32)                     # (N0, HW)
    feat = jnp.dot(oh_hw, xmap, preferred_element_type=jnp.float32)    # (N0, Dout)
    featw = feat * aw                                                  # agg-weighted

    halves = []
    for par in range(PAIR):                                            # even / odd token rows
        tok = jax.lax.broadcasted_iota(jnp.int32, (Np, n0), 0) * PAIR + par
        ohT = (tok == idx_agg).astype(jnp.float32)                     # (Np, N0)
        num = jnp.dot(ohT, featw, preferred_element_type=jnp.float32)  # (Np, Dout)
        den = jnp.dot(ohT, aw, preferred_element_type=jnp.float32)     # (Np, 1)
        map_tok = num / (den + 1e-6)
        x_half = xpk[:, par * C:(par + 1) * C]                         # (Np, C) bf16
        y = map_tok + jnp.dot(x_half, ws, preferred_element_type=jnp.float32)
        mean = jnp.mean(y, axis=-1, keepdims=True)
        var = jnp.mean((y - mean) ** 2, axis=-1, keepdims=True)
        halves.append((y - mean) * jax.lax.rsqrt(var + eps) * g + b)
    res = halves[0] if PAIR == 1 else jnp.concatenate(halves, axis=-1)
    o_ref[0] = res.astype(o_ref.dtype)


def fused_map2token_skip_ln(x_map2, x, idx_hw, idx_agg, agg_weight,
                            w_skip, ln_g, ln_b):
    B, OH, OW, Dout = x_map2.shape
    _, N, C = x.shape
    N0 = idx_hw.shape[1]
    HW = OH * OW
    PAIR = (128 // Dout
            if (Dout < 128 and 128 % Dout == 0 and N % (128 // Dout) == 0) else 1)
    x_packed = x.reshape(B, N // PAIR, PAIR * C).astype(jnp.bfloat16)
    out = pl.pallas_call(
        functools.partial(_fused_map2token_kernel, PAIR=PAIR),
        out_shape=jax.ShapeDtypeStruct((B, N // PAIR, PAIR * Dout), jnp.float32),
        grid=(B,),
        in_specs=[pl.BlockSpec((1, HW, Dout), lambda bb: (bb, 0, 0)),
                  pl.BlockSpec((1, N0, 1), lambda bb: (bb, 0, 0)),
                  pl.BlockSpec((1, 1, N0), lambda bb: (bb, 0, 0)),
                  pl.BlockSpec((1, N0, 1), lambda bb: (bb, 0, 0)),
                  pl.BlockSpec((1, N // PAIR, PAIR * C), lambda bb: (bb, 0, 0)),
                  pl.BlockSpec((C, Dout), lambda bb: (0, 0)),
                  pl.BlockSpec((1, Dout), lambda bb: (0, 0)),
                  pl.BlockSpec((1, Dout), lambda bb: (0, 0))],
        out_specs=pl.BlockSpec((1, N // PAIR, PAIR * Dout), lambda bb: (bb, 0, 0)),
        compiler_params=pltpu.CompilerParams(
            dimension_semantics=("parallel",)),
    )(x_map2.reshape(B, HW, Dout),
      idx_hw.reshape(B, N0, 1).astype(jnp.int32),
      idx_agg.reshape(B, 1, N0).astype(jnp.int32),
      agg_weight.reshape(B, N0, 1).astype(jnp.float32),
      x_packed,
      w_skip.astype(jnp.bfloat16),
      ln_g.reshape(1, Dout).astype(jnp.float32),
      ln_b.reshape(1, Dout).astype(jnp.float32))
    return out.reshape(B, N, Dout)


# ----------------------------------------------------------------------------- #
# Pallas kernel 4: pairwise distance matrix (DPC-kNN), f32 Gram, no transpose
# ----------------------------------------------------------------------------- #
def _cdist_kernel(x_ref, o_ref, *, inv_sqrt_d):
    x = x_ref[0].astype(jnp.float32)                                   # (N, D)
    sq = jnp.sum(x * x, axis=-1, keepdims=True)                        # (N, 1)
    # contract both last dims directly: no explicit .T into the MXU feed
    g = jax.lax.dot_general(x, x, (((1,), (1,)), ((), ())),
                            preferred_element_type=jnp.float32)        # (N, N)
    d2 = jnp.maximum(sq + jnp.transpose(sq) - 2.0 * g, 0.0)
    o_ref[0] = (jnp.sqrt(d2) * inv_sqrt_d).astype(o_ref.dtype)


def pairwise_dist(x):
    # TODO(synk): for production N (>~2K) tile into (q,k) blocks so the O(N^2) output
    # block fits v7x's smaller VMEM and pipelines; N is small in this config.
    B, N, D = x.shape
    return pl.pallas_call(
        functools.partial(_cdist_kernel, inv_sqrt_d=1.0 / math.sqrt(D)),
        out_shape=jax.ShapeDtypeStruct((B, N, N), jnp.float32),
        grid=(B,),
        in_specs=[pl.BlockSpec((1, N, D), lambda b: (b, 0, 0))],
        out_specs=pl.BlockSpec((1, N, N), lambda b: (b, 0, 0)),
        compiler_params=pltpu.CompilerParams(
            dimension_semantics=("parallel",)),
    )(x)


# ----------------------------------------------------------------------------- #
# index math / conv im2col / clustering glue
# ----------------------------------------------------------------------------- #
def _grid_index(loc_orig, H, W):
    loc = jnp.clip(loc_orig, -1.0, 1.0)
    loc = (loc + 1.0) / 2.0 * jnp.array([W, H], jnp.float32)[None, None, :] - 0.5
    loc = jnp.round(loc).astype(jnp.int32)
    gx = jnp.clip(loc[..., 0], 0, W - 1)
    gy = jnp.clip(loc[..., 1], 0, H - 1)
    return gy * W + gx                                                 # (B, N0)


def conv3x3_s2(x_map_nhwc, conv_w, conv_b):
    # TODO(synk): at large H,W replace the 9-slice im2col with an in-kernel
    # strided-window DMA; here the buffer is built once in bf16 (half the bytes).
    B, H, W, C = x_map_nhwc.shape
    OH = (H + 2 - 3) // 2 + 1
    OW = (W + 2 - 3) // 2 + 1
    xp = jnp.pad(x_map_nhwc.astype(jnp.bfloat16), ((0, 0), (1, 1), (1, 1), (0, 0)))
    cols = []
    for kh in range(3):
        for kw in range(3):
            cols.append(xp[:, kh::2, kw::2, :][:, :OH, :OW, :])
    patches = jnp.concatenate(cols, axis=-1)                           # (B,OH,OW,9C) bf16
    w_flat = jnp.transpose(conv_w, (2, 3, 1, 0)).reshape(9 * C, -1)    # (9C, dim_out)
    a = patches.reshape(B * OH * OW, 9 * C)
    out = matmul_bias(a, w_flat, conv_b.reshape(1, -1))                # Pallas GEMM
    return out.reshape(B, OH, OW, -1), OH, OW


def cluster_dpc_knn(x, cluster_num, k):
    B, N, _ = x.shape
    dist_matrix = pairwise_dist(x)                                     # (B,N,N) Pallas
    neg_topk, _ = jax.lax.top_k(-dist_matrix, k)
    dist_nearest = -neg_topk
    density = jnp.exp(-jnp.mean(dist_nearest ** 2, axis=-1))
    # TODO(synk): reference adds torch.rand()*1e-6 tie-breaking noise; omitted.
    mask = (density[:, None, :] > density[:, :, None]).astype(dist_matrix.dtype)
    dist_max = jnp.max(dist_matrix.reshape(B, -1), axis=-1)[:, None, None]
    dist_parent = jnp.min(dist_matrix * mask + dist_max * (1.0 - mask), axis=-1)
    score = dist_parent * density
    _, index_down = jax.lax.top_k(score, cluster_num)                  # (B, cluster_num)
    dist_to_centers = jnp.take_along_axis(
        dist_matrix, jnp.broadcast_to(index_down[:, :, None], (B, cluster_num, N)),
        axis=1)
    idx_cluster = jnp.argmin(dist_to_centers, axis=1).astype(jnp.int32)
    b_idx = jnp.arange(B)[:, None]
    idx_cluster = idx_cluster.at[b_idx, index_down].set(
        jnp.broadcast_to(jnp.arange(cluster_num, dtype=jnp.int32)[None, :],
                         (B, cluster_num)))
    return idx_cluster


def merge_tokens_agg(x, idx_agg, idx_cluster, cluster_num, weight):
    # scatter-free: one-hot einsums land on the MXU instead of XLA scatter
    B, N, C = x.shape
    onehot = jax.nn.one_hot(idx_cluster, cluster_num, dtype=jnp.float32)   # (B,N,S)
    w = weight[..., 0]                                                     # (B,N)
    all_weight = jnp.einsum('bns,bn->bs', onehot, w) + 1e-6                # (B,S)
    denom = jnp.einsum('bns,bs->bn', onehot, all_weight)                   # gathered
    norm_weight = (w / denom)[..., None]                                   # (B,N,1)
    x_merged = jnp.einsum('bns,bnc->bsc', onehot, x * norm_weight)         # (B,S,C)
    idx_agg_down = jnp.take_along_axis(idx_cluster, idx_agg, axis=1)       # (B,N0)
    weight_t = jnp.take_along_axis(norm_weight[..., 0], idx_agg, axis=1)[..., None]
    return x_merged, idx_agg_down, weight_t


# ----------------------------------------------------------------------------- #
# Full forward
# ----------------------------------------------------------------------------- #
def ctm_partpad_forward(params, input_dict, *, sample_ratio=0.25, k=5,
                        nh=1, nw=1, with_act=True):
    input_dict = dict(input_dict)
    x = input_dict['x']
    loc_orig = input_dict['loc_orig']
    idx_agg = input_dict['idx_agg']
    agg_weight = input_dict['agg_weight']
    H, W = input_dict['map_size']
    B, N, C = x.shape
    dim_out = params['conv_w'].shape[0]

    # token2map (one-hot MXU scatter) -> 3x3/s2 conv (im2col GEMM) ->
    # fused map2token gather + skip-linear + LayerNorm (one Pallas kernel per batch)
    idx_hw_in = _grid_index(loc_orig, H, W)
    x_map = token2map_pallas(x, idx_hw_in, idx_agg, H, W)               # (B,H,W,C)
    x_map2, OH, OW = conv3x3_s2(x_map, params['conv_w'], params['conv_b'])
    idx_hw_out = _grid_index(loc_orig, OH, OW)
    x_norm = fused_map2token_skip_ln(
        x_map2, x, idx_hw_out, idx_agg, agg_weight,
        params['skip_w'], params['ln_g'], params['ln_b'])               # (B,N,dim_out)

    # conf / exp kept in XLA: avoids (M,1) masked store streams out of the kernel
    conf = jnp.einsum('bnd,d->bn', x_norm, params['conf_w'])[..., None] + params['conf_b']
    weight = jnp.exp(conf)

    # cluster count
    sample_num = max(math.ceil(N * sample_ratio), 1)
    num_part = nh * nw
    sample_num = round(sample_num // num_part) * num_part

    # nh = nw = 1  ->  single partition, plain DPC-kNN clustering + weighted merge
    idx_cluster = cluster_dpc_knn(x_norm, sample_num, k)
    x_down, idx_agg_down, weight_t = merge_tokens_agg(
        x_norm, idx_agg, idx_cluster, sample_num, weight)

    agg_weight_down = agg_weight * weight_t
    agg_weight_down = agg_weight_down / jnp.max(agg_weight_down, axis=1, keepdims=True)

    x_up = x_norm
    if with_act:
        x_down = jnp.maximum(x_down, 0.0)
        x_up = jnp.maximum(x_norm, 0.0)

    input_dict['x'] = x_up
    input_dict['conf'] = conf
    input_dict['map_size'] = [OH, OW]
    out_dict = {'x': x_down, 'idx_agg': idx_agg_down,
                'agg_weight': agg_weight_down, 'loc_orig': loc_orig,
                'map_size': [OH, OW]}
    return out_dict, input_dict


# ----------------------------------------------------------------------------- #
# main
# ----------------------------------------------------------------------------- #
if __name__ == "__main__":
    embed_dim, dim_out = 32, 64
    B, N, N0 = 2, 128, 256
    H, W = 16, 16

    key = jax.random.PRNGKey(0)
    ks = jax.random.split(key, 8)

    params = {
        'conv_w': jax.random.normal(ks[0], (dim_out, embed_dim, 3, 3), jnp.float32) * 0.05,
        'conv_b': jax.random.normal(ks[1], (dim_out,), jnp.float32) * 0.05,
        'skip_w': jax.random.normal(ks[2], (embed_dim, dim_out), jnp.float32) * 0.05,
        'ln_g':   jnp.ones((dim_out,), jnp.float32),
        'ln_b':   jnp.zeros((dim_out,), jnp.float32),
        'conf_w': jax.random.normal(ks[3], (dim_out,), jnp.float32) * 0.05,
        'conf_b': jnp.zeros((1,), jnp.float32),
    }

    input_dict = {
        'x': jax.random.normal(ks[4], (B, N, embed_dim), jnp.float32),
        'loc_orig': jax.random.uniform(ks[5], (B, N0, 2), minval=-1.0, maxval=1.0),
        'idx_agg': jax.random.randint(ks[6], (B, N0), 0, N, dtype=jnp.int32),
        'agg_weight': jax.random.uniform(ks[7], (B, N0, 1), minval=0.1, maxval=1.0),
        'map_size': [H, W],
    }

    out_dict, updated_dict = ctm_partpad_forward(
        params, input_dict, sample_ratio=0.25, k=5, nh=1, nw=1, with_act=True)

    jax.block_until_ready(out_dict['x'])
    jax.block_until_ready(out_dict['agg_weight'])
    jax.block_until_ready(updated_dict['x'])
    jax.block_until_ready(updated_dict['conf'])

    assert out_dict['x'].shape == (B, 32, dim_out)
    assert out_dict['idx_agg'].shape == (B, N0)
    assert out_dict['agg_weight'].shape == (B, N0, 1)
    assert updated_dict['x'].shape == (B, N, dim_out)
    assert updated_dict['map_size'] == [8, 8]

    print("KERNEL_OK")
</pallas_src>

<mosaic_0001>
module attributes {stable_mosaic.version = 11 : i64} {
  func.func @_token2map_kernel(%arg0: i32, %arg1: memref<1x1x256xi32, #tpu.memory_space<vmem>>, %arg2: memref<1x256x1xi32, #tpu.memory_space<vmem>>, %arg3: memref<1x128x32xf32, #tpu.memory_space<vmem>>, %arg4: memref<1x64x128xf32, #tpu.memory_space<vmem>>) attributes {dimension_semantics = [#tpu.dimension_semantics<parallel>], iteration_bounds = array<i64: 2>, scalar_prefetch = 0 : i64, scratch_operands = 0 : i64, tpu.core_type = #tpu.core_type<tc>, window_params = [{transform_indices = @transform_0, window_bounds = array<i64: 1, 1, 256>}, {transform_indices = @transform_1, window_bounds = array<i64: 1, 256, 1>}, {transform_indices = @transform_2, window_bounds = array<i64: 1, 128, 32>}, {transform_indices = @transform_3, window_bounds = array<i64: 1, 64, 128>}]} {
    %c0 = arith.constant 0 : index
    %c0_0 = arith.constant 0 : index
    %c0_1 = arith.constant 0 : index
    %0 = vector.load %arg1[%c0, %c0_0, %c0_1] : memref<1x1x256xi32, #tpu.memory_space<vmem>>, vector<1x1x256xi32>
    %1 = vector.shape_cast %0 : vector<1x1x256xi32> to vector<1x256xi32>
    %c0_2 = arith.constant 0 : index
    %c0_3 = arith.constant 0 : index
    %c0_4 = arith.constant 0 : index
    %2 = vector.load %arg2[%c0_2, %c0_3, %c0_4] : memref<1x256x1xi32, #tpu.memory_space<vmem>>, vector<1x256x1xi32>
    %3 = vector.shape_cast %2 : vector<1x256x1xi32> to vector<256x1xi32>
    %c0_5 = arith.constant 0 : index
    %c0_6 = arith.constant 0 : index
    %c0_7 = arith.constant 0 : index
    %4 = vector.load %arg3[%c0_5, %c0_6, %c0_7] : memref<1x128x32xf32, #tpu.memory_space<vmem>>, vector<1x128x32xf32>
    %5 = vector.shape_cast %4 : vector<1x128x32xf32> to vector<128x32xf32>
    %6 = tpu.iota {dimensions = array<i32: 1>} : vector<256x128xi32>
    %7 = vector.broadcast %3 : vector<256x1xi32> to vector<256x128xi32>
    %8 = arith.cmpi eq, %7, %6 : vector<256x128xi32>
    %9 = arith.extui %8 : vector<256x128xi1> to vector<256x128xi32>
    %10 = arith.sitofp %9 : vector<256x128xi32> to vector<256x128xf32>
    %cst = arith.constant dense<0.000000e+00> : vector<256x32xf32>
    %11 = tpu.matmul %10, %5, %cst {dimension_numbers = #tpu.dot_dimension_numbers<[1], [0], [0], [1], [0, 0, 1, 1], [], []>} : vector<256x128xf32>, vector<128x32xf32>, vector<256x32xf32> -> vector<256x32xf32>
    %cst_8 = arith.constant 1.000000e+00 : f32
    %12 = vector.broadcast %cst_8 : f32 to vector<256x1xf32>
    %13 = tpu.iota {dimensions = array<i32: 0>} : vector<64x256xi32>
    %c4_i32 = arith.constant 4 : i32
    %14 = vector.broadcast %c4_i32 : i32 to vector<64x256xi32>
    %15 = arith.muli %13, %14 : vector<64x256xi32>
    %c0_i32 = arith.constant 0 : i32
    %16 = vector.broadcast %c0_i32 : i32 to vector<64x256xi32>
    %17 = arith.addi %15, %16 : vector<64x256xi32>
    %18 = vector.broadcast %1 : vector<1x256xi32> to vector<64x256xi32>
    %19 = arith.cmpi eq, %17, %18 : vector<64x256xi32>
    %20 = arith.extui %19 : vector<64x256xi1> to vector<64x256xi32>
    %21 = arith.sitofp %20 : vector<64x256xi32> to vector<64x256xf32>
    %cst_9 = arith.constant dense<0.000000e+00> : vector<64x32xf32>
    %22 = tpu.matmul %21, %11, %cst_9 {dimension_numbers = #tpu.dot_dimension_numbers<[1], [0], [0], [1], [0, 0, 1, 1], [], []>} : vector<64x256xf32>, vector<256x32xf32>, vector<64x32xf32> -> vector<64x32xf32>
    %cst_10 = arith.constant dense<0.000000e+00> : vector<64x1xf32>
    %23 = tpu.matmul %21, %12, %cst_10 {dimension_numbers = #tpu.dot_dimension_numbers<[1], [0], [0], [1], [0, 0, 1, 1], [], []>} : vector<64x256xf32>, vector<256x1xf32>, vector<64x1xf32> -> vector<64x1xf32>
    %cst_11 = arith.constant 9.99999997E-7 : f32
    %24 = vector.broadcast %cst_11 : f32 to vector<64x1xf32>
    %25 = arith.addf %23, %24 : vector<64x1xf32>
    %26 = vector.broadcast %25 : vector<64x1xf32> to vector<64x32xf32>
    %27 = arith.divf %22, %26 : vector<64x32xf32>
    %28 = tpu.iota {dimensions = array<i32: 0>} : vector<64x256xi32>
    %c4_i32_12 = arith.constant 4 : i32
    %29 = vector.broadcast %c4_i32_12 : i32 to vector<64x256xi32>
    %30 = arith.muli %28, %29 : vector<64x256xi32>
    %c1_i32 = arith.constant 1 : i32
    %31 = vector.broadcast %c1_i32 : i32 to vector<64x256xi32>
    %32 = arith.addi %30, %31 : vector<64x256xi32>
    %33 = vector.broadcast %1 : vector<1x256xi32> to vector<64x256xi32>
    %34 = arith.cmpi eq, %32, %33 : vector<64x256xi32>
    %35 = arith.extui %34 : vector<64x256xi1> to vector<64x256xi32>
    %36 = arith.sitofp %35 : vector<64x256xi32> to vector<64x256xf32>
    %cst_13 = arith.constant dense<0.000000e+00> : vector<64x32xf32>
    %37 = tpu.matmul %36, %11, %cst_13 {dimension_numbers = #tpu.dot_dimension_numbers<[1], [0], [0], [1], [0, 0, 1, 1], [], []>} : vector<64x256xf32>, vector<256x32xf32>, vector<64x32xf32> -> vector<64x32xf32>
    %cst_14 = arith.constant dense<0.000000e+00> : vector<64x1xf32>
    %38 = tpu.matmul %36, %12, %cst_14 {dimension_numbers = #tpu.dot_dimension_numbers<[1], [0], [0], [1], [0, 0, 1, 1], [], []>} : vector<64x256xf32>, vector<256x1xf32>, vector<64x1xf32> -> vector<64x1xf32>
    %cst_15 = arith.constant 9.99999997E-7 : f32
    %39 = vector.broadcast %cst_15 : f32 to vector<64x1xf32>
    %40 = arith.addf %38, %39 : vector<64x1xf32>
    %41 = vector.broadcast %40 : vector<64x1xf32> to vector<64x32xf32>
    %42 = arith.divf %37, %41 : vector<64x32xf32>
    %43 = tpu.iota {dimensions = array<i32: 0>} : vector<64x256xi32>
    %c4_i32_16 = arith.constant 4 : i32
    %44 = vector.broadcast %c4_i32_16 : i32 to vector<64x256xi32>
    %45 = arith.muli %43, %44 : vector<64x256xi32>
    %c2_i32 = arith.constant 2 : i32
    %46 = vector.broadcast %c2_i32 : i32 to vector<64x256xi32>
    %47 = arith.addi %45, %46 : vector<64x256xi32>
    %48 = vector.broadcast %1 : vector<1x256xi32> to vector<64x256xi32>
    %49 = arith.cmpi eq, %47, %48 : vector<64x256xi32>
    %50 = arith.extui %49 : vector<64x256xi1> to vector<64x256xi32>
    %51 = arith.sitofp %50 : vector<64x256xi32> to vector<64x256xf32>
    %cst_17 = arith.constant dense<0.000000e+00> : vector<64x32xf32>
    %52 = tpu.matmul %51, %11, %cst_17 {dimension_numbers = #tpu.dot_dimension_numbers<[1], [0], [0], [1], [0, 0, 1, 1], [], []>} : vector<64x256xf32>, vector<256x32xf32>, vector<64x32xf32> -> vector<64x32xf32>
    %cst_18 = arith.constant dense<0.000000e+00> : vector<64x1xf32>
    %53 = tpu.matmul %51, %12, %cst_18 {dimension_numbers = #tpu.dot_dimension_numbers<[1], [0], [0], [1], [0, 0, 1, 1], [], []>} : vector<64x256xf32>, vector<256x1xf32>, vector<64x1xf32> -> vector<64x1xf32>
    %cst_19 = arith.constant 9.99999997E-7 : f32
    %54 = vector.broadcast %cst_19 : f32 to vector<64x1xf32>
    %55 = arith.addf %53, %54 : vector<64x1xf32>
    %56 = vector.broadcast %55 : vector<64x1xf32> to vector<64x32xf32>
    %57 = arith.divf %52, %56 : vector<64x32xf32>
    %58 = tpu.iota {dimensions = array<i32: 0>} : vector<64x256xi32>
    %c4_i32_20 = arith.constant 4 : i32
    %59 = vector.broadcast %c4_i32_20 : i32 to vector<64x256xi32>
    %60 = arith.muli %58, %59 : vector<64x256xi32>
    %c3_i32 = arith.constant 3 : i32
    %61 = vector.broadcast %c3_i32 : i32 to vector<64x256xi32>
    %62 = arith.addi %60, %61 : vector<64x256xi32>
    %63 = vector.broadcast %1 : vector<1x256xi32> to vector<64x256xi32>
    %64 = arith.cmpi eq, %62, %63 : vector<64x256xi32>
    %65 = arith.extui %64 : vector<64x256xi1> to vector<64x256xi32>
    %66 = arith.sitofp %65 : vector<64x256xi32> to vector<64x256xf32>
    %cst_21 = arith.constant dense<0.000000e+00> : vector<64x32xf32>
    %67 = tpu.matmul %66, %11, %cst_21 {dimension_numbers = #tpu.dot_dimension_numbers<[1], [0], [0], [1], [0, 0, 1, 1], [], []>} : vector<64x256xf32>, vector<256x32xf32>, vector<64x32xf32> -> vector<64x32xf32>
    %cst_22 = arith.constant dense<0.000000e+00> : vector<64x1xf32>
    %68 = tpu.matmul %66, %12, %cst_22 {dimension_numbers = #tpu.dot_dimension_numbers<[1], [0], [0], [1], [0, 0, 1, 1], [], []>} : vector<64x256xf32>, vector<256x1xf32>, vector<64x1xf32> -> vector<64x1xf32>
    %cst_23 = arith.constant 9.99999997E-7 : f32
    %69 = vector.broadcast %cst_23 : f32 to vector<64x1xf32>
    %70 = arith.addf %68, %69 : vector<64x1xf32>
    %71 = vector.broadcast %70 : vector<64x1xf32> to vector<64x32xf32>
    %72 = arith.divf %67, %71 : vector<64x32xf32>
    %73 = tpu.concatenate %27, %42, %57, %72 in 1 : vector<64x32xf32>, vector<64x32xf32>, vector<64x32xf32>, vector<64x32xf32> -> vector<64x128xf32>
    %c0_24 = arith.constant 0 : index
    %c0_25 = arith.constant 0 : index
    %c0_26 = arith.constant 0 : index
    %74 = vector.load %arg4[%c0_24, %c0_25, %c0_26] : memref<1x64x128xf32, #tpu.memory_space<vmem>>, vector<1x64x128xf32>
    %75 = vector.shape_cast %74 : vector<1x64x128xf32> to vector<64x128xf32>
    %76 = vector.shape_cast %73 : vector<64x128xf32> to vector<1x64x128xf32>
    tpu.vector_store %arg4[%c0_24, %c0_25, %c0_26], %76 {strides = array<i32>} : memref<1x64x128xf32, #tpu.memory_space<vmem>>, vector<1x64x128xf32>,
    return
  }
  func.func @transform_0(%arg0: i32) -> (i32, i32, i32) {
    %c0_i32 = arith.constant 0 : i32
    %c0_i32_0 = arith.constant 0 : i32
    %c0_i32_1 = arith.constant 0 : i32
    return %arg0, %c0_i32, %c0_i32_0 : i32, i32, i32
  }
  func.func @transform_1(%arg0: i32) -> (i32, i32, i32) {
    %c0_i32 = arith.constant 0 : i32
    %c0_i32_0 = arith.constant 0 : i32
    %c0_i32_1 = arith.constant 0 : i32
    return %arg0, %c0_i32, %c0_i32_0 : i32, i32, i32
  }
  func.func @transform_2(%arg0: i32) -> (i32, i32, i32) {
    %c0_i32 = arith.constant 0 : i32
    %c0_i32_0 = arith.constant 0 : i32
    %c0_i32_1 = arith.constant 0 : i32
    return %arg0, %c0_i32, %c0_i32_0 : i32, i32, i32
  }
  func.func @transform_3(%arg0: i32) -> (i32, i32, i32) {
    %c0_i32 = arith.constant 0 : i32
    %c0_i32_0 = arith.constant 0 : i32
    %c0_i32_1 = arith.constant 0 : i32
    return %arg0, %c0_i32, %c0_i32_0 : i32, i32, i32
  }
}

</mosaic_0001>

<bundles_post_ra>
// kernel: tpu_custom_call.1
= control target key start
LH: loop header
LB: loop body
LE: loop exit
PB: predicated region body
PF: predicated region fallthrough
CT: control target
= control target key end

     0   :  { %8 = vsyncpa [#allocation3], 0  ;;  %s4803_s0 = inlined_call_operand.vmem [shape: s32[2,1,256], index: 0, kind: input, shape index: {}]   ;;  %s4804_s1 = inlined_call_operand.vmem [shape: s32[2,256,1], index: 1, kind: input, shape index: {}]   ;;  %s4805_s2 = inlined_call_operand.vmem [shape: f32[2,128,32], index: 2, kind: input, shape index: {}]   ;;  %s4806_s3 = inlined_call_operand.hbm [shape: f32[2,64,128], index: 3, kind: output, shape index: {}]  }
   0x1   :  { %10 = vsyncpa [#allocation3 + $0x1], 0  ;;  %s3490_s12 = smov 0   ;;  %s3492_s13 = smov 0  }
   0x2   :  { %s3494_s14 = smov 0   ;;  %s3496_s15 = smov 0  }
   0x3 LB: > { %s3511_s16 = sadd.s32 4294967295, %s3459_s15   ;;  %s2210_s17 = sadd.s32 4294967294, %s3459_s15   ;;  %s3459_s15 = sphi %s3496_s15, %s4884_s15   ;;  %s3455_s14 = sphi %s3494_s14, %s4883_s14   ;;  %s3451_s13 = sphi %s3492_s13, %s4882_s13   ;;  %s3447_s12 = sphi %s3490_s12, %s4881_s12  }
   0x4   : > { %s3515_s18 = sadd.s32 1, %s3459_s15   ;;  %s101_s19 = sadd.s32 1, %s3455_s14 }
   0x5   : > { %s98_s20 = ssub.s32 %s3459_s15, %s3515_s18  ;;  %p111_p0 = scmp.ne.s32.totalorder %s3455_s14, %s3451_s13 }
   0x6   : > { %p99_p1 = scmp.eq.s32.totalorder %s98_s20, 0  ;;  %p112_p2 = scmp.eq.s32.totalorder %s3511_s16, 1 }
   0x7   : > { %p117_p3 = scmp.ne.s32.totalorder %s3451_s13, %s3447_s12  ;;  %p118_p4 = scmp.eq.s32.totalorder %s2210_s17, 1 }
   0x8   : > { %s3526_s21 = scalar_select %p99_p1, %s3455_s14, %s101_s19  }
   0x9   : > { %p3528_p5 = por %p112_p2, %p111_p0  ;;  %p3532_p6 = por %p118_p4, %p117_p3 }
   0xa   : > { %p2213_p7 = scmp.ge.s32.totalorder %s3459_s15, 1  ;;  %p159_p8 = scmp.lt.s32.totalorder %s3459_s15, 3 }
   0xc   : > { %p160_p9 = pnand %p2213_p7, %p159_p8 }
   0xd   : > { %p192_p10 = scmp.lt.s32.totalorder (!%p160_p9), %s3511_s16, 1  ;;  %v3461_v0 = vmov (!%p160_p9), 0   ;;  %v255_v57 = vlaneseq (!%p160_p9)  ;;  %v3462_v61 = vmov (!%p160_p9), 1.0   ;;  %s3464_s10 = smov (!%p160_p9), 32  }
   0xe   : > { %163 = sbr.rel (%p160_p9) target bundleno = 1083 (0x43b), region = 32  ;;  %3332 = vset.pattern.permute.xlu1 (!%p160_p9), %v3461_v0  ;;  %3331 = vset.pattern.permute.xlu0 (!%p160_p9), %v3461_v0  ;;  %s3465_s11 = smov (!%p160_p9), 64  }
   0xf   : > { %v3603_v58 = vand.u32 (!%p160_p9), 127, %v255_v57  ;;  %s3466_s17 = smov (!%p160_p9), 96   ;;  %s189_s19 = sand.u32 (!%p160_p9), 1, %s3451_s13  }
  0x10   : > { %s2214_s20 = sshll.u32 (!%p160_p9), %s189_s19, 6  ;;  %s3467_s4 = smov (!%p160_p9), [#allocation2]  }
  0x15   : > { %s3540_s24 = scalar_select %p192_p10, %s3511_s16, 1 }
  0x17   : > { %s2481_s25 = sshll.u32 %s3540_s24, 8  ;;  %s2482_s29 = sshll.u32 %s3540_s24, 7 }
  0x18   : > { %s3546_s28 = scalar_lea.vmem %s4804_s1, %s2481_s25  ;;  %s3558_s5 = scalar_lea.vmem %s4805_s2, %s2482_s29 }
  0x19   : > { %v209_v1 = vld [vmem:[%s3546_s28 + $0x10] sm:$0xff]  ;;  %v207_v2 = vld [vmem:[%s3546_s28] sm:$0xff]  ;;  %v210_v3 = vld [vmem:[%s3546_s28 + $0x18] sm:$0xff]  ;;  %s2215_s6 = sshll.u32 %s3540_s24, 1  ;;  %s4713_s24 = scalar_lea.vmem [#allocation2], %s2214_s20 }
  0x1a   : > { %264 = vperm.xlu1 %3332, %v209_v1   ;;  %258 = vperm.xlu0 %3331, %v207_v2   ;;  %v208_v4 = vld [vmem:[%s3546_s28 + $0x8] sm:$0xff]  ;;  %v211_v6 = vld [vmem:[%s3546_s28 + $0x20] sm:$0xff]  ;;  %v214_v7 = vld [vmem:[%s3546_s28 + $0x38] sm:$0xff]  ;;  %s195_s9 = scalar_lea.vmem %s4803_s0, %s2215_s6  ;;  %s2483_s25 = sshll.u32 %s3511_s16, 10 }
  0x1b   : > { %v212_v5 = vld [vmem:[%s3546_s28 + $0x28] sm:$0xff]  ;;  %v213_v8 = vld [vmem:[%s3546_s28 + $0x30] sm:$0xff]  ;;  %v239_v9 = vld [vmem:[%s3558_s5] sm:$0xff]  ;;  %s2124_s26 = sshll.u32 %s4713_s24, 4  ;;  %s4753_s29 = scalar_lea.hbm %s4806_s3, %s2483_s25  ;;  %s4755_s26 = int_to_ptr.vmem [resolvable:$true] %s2124_s26 }
  0x1c   : > { %v240_v10 = vld [vmem:[%s3558_s5 + $0x8] sm:$0xff]  ;;  %v241_v11 = vld [vmem:[%s3558_s5 + $0x10] sm:$0xff]  ;;  %v242_v13 = vld [vmem:[%s3558_s5 + $0x18] sm:$0xff]  ;;  %s4762_s16 = scalar_lea.sflag [#allocation3], %s189_s19  ;;  %s3397_s30 = scalar_lea.vmem %s4755_s26, 1024 }
  0x1d   : > { %v3060_v12 = vpack.c.bf16 %v240_v10, %v239_v9  ;;  %v3064_v14 = vpack.c.bf16 %v242_v13, %v241_v11  ;;  %v243_v15 = vld [vmem:[%s3558_s5 + $0x20] sm:$0xff]  ;;  %v244_v16 = vld [vmem:[%s3558_s5 + $0x28] sm:$0xff]  ;;  %v245_v20 = vld [vmem:[%s3558_s5 + $0x30] sm:$0xff]  ;;  %p3398_p11 = scmp.ne.s32.totalorder %s4755_s26, %s3397_s30 }
  0x1e   : > { %267 = vperm.xlu1 %3332, %v210_v3   ;;  %261 = vperm.xlu0 %3331, %v208_v4   ;;  %v216_v17 = vld [vmem:[%s3546_s28 + $0x48] sm:$0xff]  ;;  %v215_v18 = vld [vmem:[%s3546_s28 + $0x40] sm:$0xff]  ;;  %v3068_v19 = vpack.c.bf16 %v244_v16, %v243_v15  ;;  %v246_v21 = vld [vmem:[%s3558_s5 + $0x38] sm:$0xff] }
  0x1f   : > { %3061 = vmatprep.subr.bf16.mxu0 %v3060_v12  ;;  %v218_v22 = vld [vmem:[%s3546_s28 + $0x58] sm:$0xff]  ;;  %v217_v23 = vld [vmem:[%s3546_s28 + $0x50] sm:$0xff]  ;;  %v3072_v24 = vpack.c.bf16 %v246_v21, %v245_v20  ;;  %v247_v25 = vld [vmem:[%s3558_s5 + $0x40] sm:$0xff]  ;;  %p3399_p12 = pnand %p3398_p11, %p3528_p5 }
  0x20   : > { %3063 = vmatpush3.bf16.msra.mxu0 %v3060_v12  ;;  %v248_v26 = vld [vmem:[%s3558_s5 + $0x48] sm:$0xff]  ;;  %v219_v28 = vld [vmem:[%s3546_s28 + $0x60] sm:$0xff]  ;;  %v249_v30 = vld [vmem:[%s3558_s5 + $0x50] sm:$0xff] }
  0x21   : > { %3065 = vmatprep.subr.bf16.mxu0 %v3064_v14  ;;  %v220_v27 = vld [vmem:[%s3546_s28 + $0x68] sm:$0xff]  ;;  %v3076_v29 = vpack.c.bf16 %v248_v26, %v247_v25  ;;  %v250_v31 = vld [vmem:[%s3558_s5 + $0x58] sm:$0xff]  ;;  %v221_v33 = vld [vmem:[%s3546_s28 + $0x70] sm:$0xff]  ;;  %p3400_p13 = pneg %p3399_p12 }
  0x22   : > { %273 = vperm.xlu1 %3332, %v212_v5   ;;  %270 = vperm.xlu0 %3331, %v211_v6   ;;  %v222_v32 = vld [vmem:[%s3546_s28 + $0x78] sm:$0xff]  ;;  %v3080_v34 = vpack.c.bf16 %v250_v31, %v249_v30  ;;  %v251_v35 = vld [vmem:[%s3558_s5 + $0x60] sm:$0xff]  ;;  %v252_v36 = vld [vmem:[%s3558_s5 + $0x68] sm:$0xff] }
  0x23   : > { %v224_v37 = vld [vmem:[%s3546_s28 + $0x88] sm:$0xff]  ;;  %v223_v38 = vld [vmem:[%s3546_s28 + $0x80] sm:$0xff]  ;;  %v3084_v39 = vpack.c.bf16 %v252_v36, %v251_v35  ;;  %v253_v40 = vld [vmem:[%s3558_s5 + $0x70] sm:$0xff] }
  0x24   : > { %3067 = vmatpush3.bf16.msra.mxu0 %v3064_v14  ;;  %v254_v41 = vld [vmem:[%s3558_s5 + $0x78] sm:$0xff]  ;;  %v225_v43 = vld [vmem:[%s3546_s28 + $0x90] sm:$0xff]  ;;  %v228_v45 = vld [vmem:[%s3546_s28 + $0xa8] sm:$0xff]  ;;  %s3401_s5 = sshll.u32 %s3467_s4, 4  ;;  %s3402_s5 = int_to_ptr.vmem [resolvable:$false] %s3401_s5 }
  0x25   : > { %3069 = vmatprep.subr.bf16.mxu0 %v3068_v19  ;;  %v226_v42 = vld [vmem:[%s3546_s28 + $0x98] sm:$0xff]  ;;  %v3088_v44 = vpack.c.bf16 %v254_v41, %v253_v40  ;;  %v227_v46 = vld [vmem:[%s3546_s28 + $0xa0] sm:$0xff]  ;;  %v229_v48 = vld [vmem:[%s3546_s28 + $0xb0] sm:$0xff]  ;;  %s3403_s6 = scalar_lea.vmem %s3402_s5, 2048  ;;  %p3404_p0 = scmp.lt.s32.totalorder %s4755_s26, %s3402_s5 }
  0x26   : > { %279 = vperm.xlu1 %3332, %v214_v7   ;;  %276 = vperm.xlu0 %3331, %v213_v8   ;;  %v230_v47 = vld [vmem:[%s3546_s28 + $0xb8] sm:$0xff]  ;;  %v232_v49 = vld [vmem:[%s3546_s28 + $0xc8] sm:$0xff]  ;;  %v231_v50 = vld [vmem:[%s3546_s28 + $0xc0] sm:$0xff]  ;;  %p3405_p1 = scmp.lt.s32.totalorder %s3403_s6, %s3397_s30 }
  0x27   : > { %v234_v51 = vld [vmem:[%s3546_s28 + $0xd8] sm:$0xff]  ;;  %v233_v52 = vld [vmem:[%s3546_s28 + $0xd0] sm:$0xff]  ;;  %v236_v53 = vld [vmem:[%s3546_s28 + $0xe8] sm:$0xff] }
  0x28   : > { %3071 = vmatpush3.bf16.msra.mxu0 %v3068_v19  ;;  %v235_v54 = vld [vmem:[%s3546_s28 + $0xe0] sm:$0xff]  ;;  %v238_v55 = vld [vmem:[%s3546_s28 + $0xf8] sm:$0xff]  ;;  %v237_v56 = vld [vmem:[%s3546_s28 + $0xf0] sm:$0xff]  ;;  %p3406_p2 = por %p3405_p1, %p3404_p0 }
  0x29   : > { %3073 = vmatprep.subr.bf16.mxu0 %v3072_v24 }
  0x2a   : > { %285 = vperm.xlu1 %3332, %v216_v17   ;;  %282 = vperm.xlu0 %3331, %v215_v18   ;;  %p3407_p3 = pnand %p3406_p2, %p3400_p13 }
  0x2c   : > { %3075 = vmatpush3.bf16.msra.mxu0 %v3072_v24 }
  0x2d   : > { %3077 = vmatprep.subr.bf16.mxu0 %v3076_v29 }
  0x2e   : > { %291 = vperm.xlu1 %3332, %v218_v22   ;;  %288 = vperm.xlu0 %3331, %v217_v23  }
  0x30   : > { %3079 = vmatpush3.bf16.msra.mxu0 %v3076_v29  ;;  %v206_v29 = vld [vmem:[%s195_s9] sm:$0x3] }
  0x31   : > { %3081 = vmatprep.subr.bf16.mxu0 %v3080_v34 }
  0x32   : > { %297 = vperm.xlu1 %3332, %v220_v27   ;;  %294 = vperm.xlu0 %3331, %v219_v28   ;;  %v3674_v28 = vshrl.u32 %v255_v57, 7 }
  0x34   : > { %3083 = vmatpush3.bf16.msra.mxu0 %v3080_v34  ;;  %v697_v30 = vsub.s32 1, %v3674_v28  ;;  %v3678_v31 = vmul.u32 4, %v3674_v28 }
  0x35   : > { %3085 = vmatprep.subr.bf16.mxu0 %v3084_v39 }
  0x36   : > { %303 = vperm.xlu1 %3332, %v222_v32   ;;  %300 = vperm.xlu0 %3331, %v221_v33   ;;  %v693_v32 = vsub.s32 0, %v3674_v28  ;;  %v3681_v33 = vrot.slane %v206_v29, %v697_v30  ;;  %v3686_v35 = vadd.s32 1, %v3678_v31 }
  0x38   : > { %3087 = vmatpush3.bf16.msra.mxu0 %v3084_v39  ;;  %v3683_v34 = vrot.slane %v206_v29, %v693_v32  ;;  %v679_v32 = vadd.s32 32, %v3674_v28 }
  0x39   : > { %3089 = vmatprep.subr.bf16.mxu0 %v3088_v44 }
  0x3a   : > { %309 = vperm.xlu1 %3332, %v224_v37   ;;  %306 = vperm.xlu0 %3331, %v223_v38  }
  0x3c   : > { %3091 = vmatpush3.bf16.msra.mxu0 %v3088_v44 }
  0x3e   : > { %315 = vperm.xlu1 %3332, %v226_v42   ;;  %312 = vperm.xlu0 %3331, %v225_v43  }
  0x42   : > { %321 = vperm.xlu1 %3332, %v228_v45   ;;  %318 = vperm.xlu0 %3331, %v227_v46  }
  0x46   : > { %327 = vperm.xlu1 %3332, %v230_v47   ;;  %324 = vperm.xlu0 %3331, %v229_v48  }
  0x4a   : > { %333 = vperm.xlu1 %3332, %v232_v49   ;;  %330 = vperm.xlu0 %3331, %v231_v50  }
  0x4e   : > { %339 = vperm.xlu1 %3332, %v234_v51   ;;  %336 = vperm.xlu0 %3331, %v233_v52  }
  0x52   : > { %345 = vperm.xlu1 %3332, %v236_v53   ;;  %342 = vperm.xlu0 %3331, %v235_v54  }
  0x56   : > { %351 = vperm.xlu1 %3332, %v238_v55   ;;  %348 = vperm.xlu0 %3331, %v237_v56  }
  0x99   : > { %v265_v59 = vpop.permute.xlu1 %264  ;;  %v259_v60 = vpop.permute.xlu0 %258 }
  0x9a   : > { %vm353_vm0 = vcmp.eq.s32.totalorder %v259_v60, %v3603_v58  ;;  %vm355_vm1 = vcmp.eq.s32.totalorder %v265_v59, %v3603_v58 }
  0x9b   : > { %3012 = vmatprep.mubr.msk.f32.mxu0 %vm353_vm0, %v3462_v61 }
  0x9d   : > { %v268_v62 = vpop.permute.xlu1 %267  ;;  %v262_v63 = vpop.permute.xlu0 %261 }
  0x9e   : > { %vm354_vm2 = vcmp.eq.s32.totalorder %v262_v63, %v3603_v58  ;;  %vm356_vm3 = vcmp.eq.s32.totalorder %v268_v62, %v3603_v58 }
  0x9f   : > { %3013 = vmatmul.mubr.msk.f32.vlgmr.msra.gmra.mrb[0].mxu0 %vm354_vm2, %v3462_v61 }
  0xa0   : > { %3015 = vmatprep.mubr.msk.f32.mxu0 %vm355_vm1, %v3462_v61 }
  0xa1   : > { %v274_v0 = vpop.permute.xlu1 %273  ;;  %v271_v1 = vpop.permute.xlu0 %270 }
  0xa2   : > { %vm357_vm4 = vcmp.eq.s32.totalorder %v271_v1, %v3603_v58  ;;  %vm358_vm5 = vcmp.eq.s32.totalorder %v274_v0, %v3603_v58 }
  0xa3   : > { %3016 = vmatmul.mubr.msk.f32.gmra.mrb[2].mxu0 %vm356_vm3, %v3462_v61 }
  0xa4   : > { %3018 = vmatprep.mubr.msk.f32.mxu0 %vm357_vm4, %v3462_v61 }
  0xa5   : > { %v280_v2 = vpop.permute.xlu1 %279  ;;  %v277_v3 = vpop.permute.xlu0 %276 }
  0xa6   : > { %vm359_vm6 = vcmp.eq.s32.totalorder %v277_v3, %v3603_v58  ;;  %vm360_vm7 = vcmp.eq.s32.totalorder %v280_v2, %v3603_v58 }
  0xa7   : > { %3019 = vmatmul.mubr.msk.f32.gmra.mrb[4].mxu0 %vm358_vm5, %v3462_v61 }
  0xa8   : > { %3021 = vmatprep.mubr.msk.f32.mxu0 %vm359_vm6, %v3462_v61 }
  0xa9   : > { %v286_v4 = vpop.permute.xlu1 %285  ;;  %v283_v5 = vpop.permute.xlu0 %282 }
  0xaa   : > { %vm361_vm8 = vcmp.eq.s32.totalorder %v283_v5, %v3603_v58  ;;  %vm362_vm9 = vcmp.eq.s32.totalorder %v286_v4, %v3603_v58 }
  0xab   : > { %3022 = vmatmul.mubr.msk.f32.gmra.mrb[6].mxu0 %vm360_vm7, %v3462_v61 }
  0xac   : > { %3024 = vmatprep.mubr.msk.f32.mxu0 %vm361_vm8, %v3462_v61 }
  0xad   : > { %v292_v6 = vpop.permute.xlu1 %291  ;;  %v289_v7 = vpop.permute.xlu0 %288 }
  0xae   : > { %vm363_vm10 = vcmp.eq.s32.totalorder %v289_v7, %v3603_v58  ;;  %vm364_vm11 = vcmp.eq.s32.totalorder %v292_v6, %v3603_v58 }
  0xaf   : > { %3025 = vmatmul.mubr.msk.f32.gmra.mrb[8].mxu0 %vm362_vm9, %v3462_v61 }
  0xb0   : > { %3027 = vmatprep.mubr.msk.f32.mxu0 %vm363_vm10, %v3462_v61 }
  0xb1   : > { %v298_v8 = vpop.permute.xlu1 %297  ;;  %v295_v9 = vpop.permute.xlu0 %294 }
  0xb2   : > { %vm365_vm12 = vcmp.eq.s32.totalorder %v295_v9, %v3603_v58  ;;  %vm366_vm13 = vcmp.eq.s32.totalorder %v298_v8, %v3603_v58 }
  0xb3   : > { %3028 = vmatmul.mubr.msk.f32.gmra.mrb[10].mxu0 %vm364_vm11, %v3462_v61 }
  0xb4   : > { %3030 = vmatprep.mubr.msk.f32.mxu0 %vm365_vm12, %v3462_v61 }
  0xb5   : > { %v304_v10 = vpop.permute.xlu1 %303  ;;  %v301_v11 = vpop.permute.xlu0 %300 }
  0xb6   : > { %vm367_vm14 = vcmp.eq.s32.totalorder %v301_v11, %v3603_v58  ;;  %vm368_vm15 = vcmp.eq.s32.totalorder %v304_v10, %v3603_v58 }
  0xb7   : > { %3031 = vmatmul.mubr.msk.f32.gmra.mrb[12].mxu0 %vm366_vm13, %v3462_v61 }
  0xb8   : > { %3033 = vmatprep.mubr.msk.f32.mxu0 %vm367_vm14, %v3462_v61 }
  0xb9   : > { %v310_v12 = vpop.permute.xlu1 %309  ;;  %v307_v13 = vpop.permute.xlu0 %306 }
  0xba   : > { %vm369_vm0 = vcmp.eq.s32.totalorder %v307_v13, %v3603_v58  ;;  %vm370_vm1 = vcmp.eq.s32.totalorder %v310_v12, %v3603_v58 }
  0xbb   : > { %3034 = vmatmul.mubr.msk.f32.gmra.mrb[14].mxu0 %vm368_vm15, %v3462_v61 }
  0xbc   : > { %3036 = vmatprep.mubr.msk.f32.mxu0 %vm369_vm0, %v3462_v61  ;;  %vm700_vm0 = vcmp.eq.s32.totalorder %v3678_v31, %v3681_v33 }
  0xbd   : > { %v316_v14 = vpop.permute.xlu1 %315  ;;  %v313_v15 = vpop.permute.xlu0 %312  ;;  %2300 = vmatprep.mubr.msk.f32.mxu1 %vm700_vm0, %v3462_v61 }
  0xbe   : > { %vm371_vm2 = vcmp.eq.s32.totalorder %v313_v15, %v3603_v58  ;;  %vm372_vm3 = vcmp.eq.s32.totalorder %v316_v14, %v3603_v58 }
  0xbf   : > { %3037 = vmatmul.mubr.msk.f32.gmra.mrb[16].mxu0 %vm370_vm1, %v3462_v61  ;;  %vm4816_vm1 = vcmp.eq.s32.totalorder %v3686_v35, %v3681_v33 }
  0xc0   : > { %3039 = vmatprep.mubr.msk.f32.mxu0 %vm371_vm2, %v3462_v61  ;;  %vm699_vm2 = vcmp.eq.s32.totalorder %v3678_v31, %v3683_v34 }
  0xc1   : > { %v322_v16 = vpop.permute.xlu1 %321  ;;  %v319_v17 = vpop.permute.xlu0 %318 }
  0xc2   : > { %vm373_vm4 = vcmp.eq.s32.totalorder %v319_v17, %v3603_v58  ;;  %vm374_vm5 = vcmp.eq.s32.totalorder %v322_v16, %v3603_v58  ;;  %v676_v16 = vadd.s32 8, %v3674_v28 }
  0xc3   : > { %3040 = vmatmul.mubr.msk.f32.gmra.mrb[18].mxu0 %vm372_vm3, %v3462_v61  ;;  %vm4814_vm3 = vcmp.eq.s32.totalorder %v3686_v35, %v3683_v34 }
  0xc4   : > { %3042 = vmatprep.mubr.msk.f32.mxu0 %vm373_vm4, %v3462_v61 }
  0xc5   : > { %v328_v18 = vpop.permute.xlu1 %327  ;;  %v325_v19 = vpop.permute.xlu0 %324 }
  0xc6   : > { %vm375_vm6 = vcmp.eq.s32.totalorder %v325_v19, %v3603_v58  ;;  %vm376_vm7 = vcmp.eq.s32.totalorder %v328_v18, %v3603_v58 }
  0xc7   : > { %3043 = vmatmul.mubr.msk.f32.gmra.mrb[20].mxu0 %vm374_vm5, %v3462_v61 }
  0xc8   : > { %3045 = vmatprep.mubr.msk.f32.mxu0 %vm375_vm6, %v3462_v61 }
  0xc9   : > { %v334_v20 = vpop.permute.xlu1 %333  ;;  %v331_v21 = vpop.permute.xlu0 %330 }
  0xca   : > { %vm377_vm8 = vcmp.eq.s32.totalorder %v331_v21, %v3603_v58  ;;  %vm378_vm9 = vcmp.eq.s32.totalorder %v334_v20, %v3603_v58  ;;  %v3757_v20 = vmul.u32 4, %v676_v16  ;;  %v677_v21 = vadd.s32 16, %v3674_v28 }
  0xcb   : > { %3046 = vmatmul.mubr.msk.f32.gmra.mrb[22].mxu0 %vm376_vm7, %v3462_v61 }
  0xcc   : > { %3048 = vmatprep.mubr.msk.f32.mxu0 %vm377_vm8, %v3462_v61  ;;  %vm702_vm4 = vcmp.eq.s32.totalorder %v3757_v20, %v3681_v33  ;;  %vm701_vm6 = vcmp.eq.s32.totalorder %v3757_v20, %v3683_v34 }
  0xcd   : > { %v340_v22 = vpop.permute.xlu1 %339  ;;  %v337_v23 = vpop.permute.xlu0 %336 }
  0xce   : > { %vm379_vm10 = vcmp.eq.s32.totalorder %v337_v23, %v3603_v58  ;;  %vm380_vm11 = vcmp.eq.s32.totalorder %v340_v22, %v3603_v58 }
  0xcf   : > { %3049 = vmatmul.mubr.msk.f32.gmra.mrb[24].mxu0 %vm378_vm9, %v3462_v61 }
  0xd0   : > { %3051 = vmatprep.mubr.msk.f32.mxu0 %vm379_vm10, %v3462_v61 }
  0xd1   : > { %v346_v24 = vpop.permute.xlu1 %345  ;;  %v343_v25 = vpop.permute.xlu0 %342 }
  0xd2   : > { %vm381_vm12 = vcmp.eq.s32.totalorder %v343_v25, %v3603_v58  ;;  %vm382_vm13 = vcmp.eq.s32.totalorder %v346_v24, %v3603_v58  ;;  %v3767_v24 = vadd.s32 1, %v3757_v20  ;;  %v3769_v25 = vmul.u32 4, %v677_v21 }
  0xd3   : > { %3052 = vmatmul.mubr.msk.f32.gmra.mrb[26].mxu0 %vm380_vm11, %v3462_v61 }
  0xd4   : > { %3054 = vmatprep.mubr.msk.f32.mxu0 %vm381_vm12, %v3462_v61  ;;  %vm4812_vm5 = vcmp.eq.s32.totalorder %v3767_v24, %v3681_v33  ;;  %v3793_v29 = vadd.s32 1, %v3769_v25  ;;  %vm4811_vm7 = vcmp.eq.s32.totalorder %v3767_v24, %v3683_v34  ;;  %vm704_vm8 = vcmp.eq.s32.totalorder %v3769_v25, %v3681_v33 }
  0xd5   : > { %v349_v26 = vpop.permute.xlu0 %348  ;;  %v352_v27 = vpop.permute.xlu1 %351  ;;  %vm703_vm10 = vcmp.eq.s32.totalorder %v3769_v25, %v3683_v34 }
  0xd6   : > { %vm383_vm14 = vcmp.eq.s32.totalorder %v349_v26, %v3603_v58  ;;  %vm384_vm15 = vcmp.eq.s32.totalorder %v352_v27, %v3603_v58  ;;  %v678_v26 = vadd.s32 24, %v3674_v28  ;;  %v3463_v27 = vmov 1.0|1.0  }
  0xd7   : > { %3055 = vmatmul.mubr.msk.f32.gmra.mrb[28].mxu0 %vm382_vm13, %v3462_v61  ;;  %vm4808_vm9 = vcmp.eq.s32.totalorder %v3793_v29, %v3681_v33  ;;  %vm4807_vm11 = vcmp.eq.s32.totalorder %v3793_v29, %v3683_v34 }
  0xd8   : > { %3057 = vmatprep.mubr.msk.f32.mxu0 %vm383_vm14, %v3462_v61  ;;  %v3795_v30 = vmul.u32 4, %v678_v26 }
  0xda   : > { %vm706_vm12 = vcmp.eq.s32.totalorder %v3795_v30, %v3681_v33  ;;  %vm705_vm14 = vcmp.eq.s32.totalorder %v3795_v30, %v3683_v34 }
  0xdb   : > { %3058 = vmatmul.mubr.msk.f32.gmra.mrb[30].mxu0 %vm384_vm15, %v3462_v61 }
  0xdc   : > { %2348 = vmatprep.mubr.msk.f32.mxu0 %vm4816_vm1, %v3462_v61 }
 0x172   : > { %v3014_v36 = vpop.f32.mrb[0].mxu0 }
 0x173   : > { %v515_v37 = vpop.f32.mrb[1].mxu0 }
 0x174   : > { %v3700_v38 = vpack.c.bf16 %v3014_v36, %v515_v37  ;;  %v3827_v36 = vadd.s32 1, %v3795_v30  ;;  %v3829_v37 = vmul.u32 4, %v679_v32 }
 0x176   : > { %v3017_v39 = vpop.f32.mrb[2].mxu0  ;;  %vm4809_vm13 = vcmp.eq.s32.totalorder %v3827_v36, %v3681_v33  ;;  %vm4810_vm15 = vcmp.eq.s32.totalorder %v3827_v36, %v3683_v34 }
 0x177   : > { %v525_v40 = vpop.f32.mrb[3].mxu0 }
 0x178   : > { %v3702_v41 = vpack.c.bf16 %v3017_v39, %v525_v40  ;;  %v680_v39 = vadd.s32 40, %v3674_v28  ;;  %v3861_v40 = vadd.s32 1, %v3829_v37 }
 0x17a   : > { %v3020_v42 = vpop.f32.mrb[4].mxu0 }
 0x17b   : > { %v535_v43 = vpop.f32.mrb[5].mxu0 }
 0x17c   : > { %v3704_v44 = vpack.c.bf16 %v3020_v42, %v535_v43  ;;  %v3863_v42 = vmul.u32 4, %v680_v39  ;;  %v681_v43 = vadd.s32 48, %v3674_v28 }
 0x17e   : > { %v3023_v45 = vpop.f32.mrb[6].mxu0 }
 0x17f   : > { %v545_v46 = vpop.f32.mrb[7].mxu0 }
 0x180   : > { %v3706_v47 = vpack.c.bf16 %v3023_v45, %v545_v46  ;;  %v3895_v45 = vadd.s32 1, %v3863_v42  ;;  %v3897_v46 = vmul.u32 4, %v681_v43 }
 0x182   : > { %v3026_v48 = vpop.f32.mrb[8].mxu0 }
 0x183   : > { %v555_v49 = vpop.f32.mrb[9].mxu0 }
 0x184   : > { %v3708_v50 = vpack.c.bf16 %v3026_v48, %v555_v49  ;;  %v682_v48 = vadd.s32 56, %v3674_v28  ;;  %v3929_v28 = vadd.s32 1, %v3897_v46 }
 0x186   : > { %v3029_v51 = vpop.f32.mrb[10].mxu0  ;;  %v3931_v49 = vmul.u32 4, %v682_v48  ;;  %vm4821_vm1 = vcmp.eq.s32.totalorder %v3929_v28, %v3681_v33 }
 0x187   : > { %v565_v52 = vpop.f32.mrb[11].mxu0 }
 0x188   : > { %v3710_v53 = vpack.c.bf16 %v3029_v51, %v565_v52  ;;  %v3962_v51 = vadd.s32 1, %v3931_v49  ;;  %v3993_v52 = vadd.s32 2, %v3678_v31 }
 0x18a   : > { %v3032_v54 = vpop.f32.mrb[12].mxu0 }
 0x18b   : > { %v575_v55 = vpop.f32.mrb[13].mxu0 }
 0x18c   : > { %v3712_v56 = vpack.c.bf16 %v3032_v54, %v575_v55  ;;  %v4031_v54 = vadd.s32 2, %v3757_v20  ;;  %v4056_v55 = vadd.s32 2, %v3769_v25 }
 0x18e   : > { %v3035_v57 = vpop.f32.mrb[14].mxu0 }
 0x18f   : > { %v585_v58 = vpop.f32.mrb[15].mxu0 }
 0x190   : > { %v3714_v59 = vpack.c.bf16 %v3035_v57, %v585_v58  ;;  %v4319_v57 = vadd.s32 3, %v3829_v37  ;;  %v4344_v58 = vadd.s32 3, %v3863_v42 }
 0x192   : > { %v3038_v60 = vpop.f32.mrb[16].mxu0 }
 0x193   : > { %v595_v62 = vpop.f32.mrb[17].mxu0 }
 0x194   : > { %v3716_v63 = vpack.c.bf16 %v3038_v60, %v595_v62  ;;  %v4394_v60 = vadd.s32 3, %v3931_v49 }
 0x196   : > { %v3041_v0 = vpop.f32.mrb[18].mxu0  ;;  %3093 = vmatprep.subr.bf16.mxu1 %v3716_v63  ;;  %3141 = vmatprep.subr.bf16.mxu0 %v3716_v63 }
 0x197   : > { %v605_v1 = vpop.f32.mrb[19].mxu0  ;;  %3095 = vmatpush3.bf16.msra.mxu1 %v3700_v38  ;;  %3143 = vmatpush3.bf16.msra.mxu0 %v3700_v38 }
 0x198   : > { %v3722_v2 = vpack.c.bf16 %v3041_v0, %v605_v1 }
 0x19a   : > { %v3044_v3 = vpop.f32.mrb[20].mxu0  ;;  %3097 = vmatprep.subr.bf16.mxu1 %v3722_v2  ;;  %3145 = vmatprep.subr.bf16.mxu0 %v3722_v2 }
 0x19b   : > { %v615_v4 = vpop.f32.mrb[21].mxu0  ;;  %3099 = vmatpush3.bf16.msra.mxu1 %v3702_v41  ;;  %3147 = vmatpush3.bf16.msra.mxu0 %v3702_v41 }
 0x19c   : > { %v3728_v5 = vpack.c.bf16 %v3044_v3, %v615_v4 }
 0x19e   : > { %v3047_v6 = vpop.f32.mrb[22].mxu0  ;;  %3101 = vmatprep.subr.bf16.mxu1 %v3728_v5  ;;  %3149 = vmatprep.subr.bf16.mxu0 %v3728_v5 }
 0x19f   : > { %v625_v7 = vpop.f32.mrb[23].mxu0  ;;  %3103 = vmatpush3.bf16.msra.mxu1 %v3704_v44  ;;  %3151 = vmatpush3.bf16.msra.mxu0 %v3704_v44 }
 0x1a0   : > { %v3734_v8 = vpack.c.bf16 %v3047_v6, %v625_v7 }
 0x1a2   : > { %v3050_v9 = vpop.f32.mrb[24].mxu0  ;;  %3105 = vmatprep.subr.bf16.mxu1 %v3734_v8  ;;  %3153 = vmatprep.subr.bf16.mxu0 %v3734_v8 }
 0x1a3   : > { %v635_v10 = vpop.f32.mrb[25].mxu0  ;;  %3107 = vmatpush3.bf16.msra.mxu1 %v3706_v47  ;;  %3155 = vmatpush3.bf16.msra.mxu0 %v3706_v47 }
 0x1a4   : > { %v3740_v11 = vpack.c.bf16 %v3050_v9, %v635_v10 }
 0x1a6   : > { %v3053_v12 = vpop.f32.mrb[26].mxu0  ;;  %3109 = vmatprep.subr.bf16.mxu1 %v3740_v11  ;;  %3157 = vmatprep.subr.bf16.mxu0 %v3740_v11 }
 0x1a7   : > { %v645_v13 = vpop.f32.mrb[27].mxu0  ;;  %3111 = vmatpush3.bf16.msra.mxu1 %v3708_v50  ;;  %3159 = vmatpush3.bf16.msra.mxu0 %v3708_v50 }
 0x1a8   : > { %v3746_v14 = vpack.c.bf16 %v3053_v12, %v645_v13 }
 0x1aa   : > { %v3056_v15 = vpop.f32.mrb[28].mxu0  ;;  %3113 = vmatprep.subr.bf16.mxu1 %v3746_v14  ;;  %3161 = vmatprep.subr.bf16.mxu0 %v3746_v14 }
 0x1ab   : > { %v655_v17 = vpop.f32.mrb[29].mxu0  ;;  %3115 = vmatpush3.bf16.msra.mxu1 %v3710_v53  ;;  %3163 = vmatpush3.bf16.msra.mxu0 %v3710_v53 }
 0x1ac   : > { %v3753_v18 = vpack.c.bf16 %v3056_v15, %v655_v17 }
 0x1ae   : > { %v3059_v19 = vpop.f32.mrb[30].mxu0  ;;  %3117 = vmatprep.subr.bf16.mxu1 %v3753_v18  ;;  %3165 = vmatprep.subr.bf16.mxu0 %v3753_v18 }
 0x1af   : > { %v665_v22 = vpop.f32.mrb[31].mxu0  ;;  %3119 = vmatpush3.bf16.msra.mxu1 %v3712_v56  ;;  %3167 = vmatpush3.bf16.msra.mxu0 %v3712_v56 }
 0x1b0   : > { %v3762_v23 = vpack.c.bf16 %v3059_v19, %v665_v22 }
 0x1b2   : > { %3121 = vmatprep.subr.bf16.mxu1 %v3762_v23  ;;  %3169 = vmatprep.subr.bf16.mxu0 %v3762_v23 }
 0x1b3   : > { %3123 = vmatpush3.bf16.msra.mxu1 %v3714_v59  ;;  %3171 = vmatpush3.bf16.msra.mxu0 %v3714_v59 }
 0x1b4   : > { %3189 = vmatprep.subr.bf16.mxu0 %v3716_v63  ;;  %3124 = vmatprep.subr.bf16.mxu1 %v3463_v27 }
 0x1b6   : > { %2301 = vmatmul.mubr.msk.f32.vlgmr.msra.gmra.mrb[0].mxu1 %vm699_vm2, %v3462_v61  ;;  %2349 = vmatmul.mubr.msk.f32.vlgmr.msra.gmra.mrb[32].mxu0 %vm4814_vm3, %v3462_v61  ;;  %vm4819_vm3 = vcmp.eq.s32.totalorder %v3895_v45, %v3683_v34 }
 0x1b7   : > { %3125 = vmatpush3.bf16.msra.mxu1 %v3463_v27  ;;  %3191 = vmatpush3.bf16.msra.mxu0 %v3700_v38 }
 0x1b8   : > { %3193 = vmatprep.subr.bf16.mxu0 %v3722_v2  ;;  %2302 = vmatprep.mubr.msk.f32.mxu1 %vm702_vm4, %v3462_v61 }
 0x1b9   : > { %3126 = vmatprep.subr.bf16.mxu1 %v3463_v27  ;;  %2350 = vmatprep.mubr.msk.f32.mxu0 %vm4812_vm5, %v3462_v61  ;;  %vm4817_vm5 = vcmp.eq.s32.totalorder %v3895_v45, %v3681_v33 }
 0x1ba   : > { %2303 = vmatmul.mubr.msk.f32.gmra.mrb[2].mxu1 %vm701_vm6, %v3462_v61  ;;  %2351 = vmatmul.mubr.msk.f32.gmra.mrb[34].mxu0 %vm4811_vm7, %v3462_v61  ;;  %vm710_vm7 = vcmp.eq.s32.totalorder %v3863_v42, %v3681_v33 }
 0x1bb   : > { %3127 = vmatpush3.bf16.msra.mxu1 %v3463_v27  ;;  %3195 = vmatpush3.bf16.msra.mxu0 %v3702_v41 }
 0x1bc   : > { %3197 = vmatprep.subr.bf16.mxu0 %v3728_v5  ;;  %2304 = vmatprep.mubr.msk.f32.mxu1 %vm704_vm8, %v3462_v61 }
 0x1bd   : > { %3128 = vmatprep.subr.bf16.mxu1 %v3463_v27  ;;  %2352 = vmatprep.mubr.msk.f32.mxu0 %vm4808_vm9, %v3462_v61  ;;  %vm4813_vm9 = vcmp.eq.s32.totalorder %v3861_v40, %v3681_v33 }
 0x1be   : > { %2305 = vmatmul.mubr.msk.f32.gmra.mrb[4].mxu1 %vm703_vm10, %v3462_v61  ;;  %2353 = vmatmul.mubr.msk.f32.gmra.mrb[36].mxu0 %vm4807_vm11, %v3462_v61  ;;  %vm708_vm11 = vcmp.eq.s32.totalorder %v3829_v37, %v3681_v33 }
 0x1bf   : > { %3129 = vmatpush3.bf16.msra.mxu1 %v3463_v27  ;;  %3199 = vmatpush3.bf16.msra.mxu0 %v3704_v44 }
 0x1c0   : > { %3201 = vmatprep.subr.bf16.mxu0 %v3734_v8  ;;  %2306 = vmatprep.mubr.msk.f32.mxu1 %vm706_vm12, %v3462_v61 }
 0x1c1   : > { %3130 = vmatprep.subr.bf16.mxu1 %v3463_v27  ;;  %2354 = vmatprep.mubr.msk.f32.mxu0 %vm4809_vm13, %v3462_v61  ;;  %vm707_vm13 = vcmp.eq.s32.totalorder %v3829_v37, %v3683_v34 }
 0x1c2   : > { %2307 = vmatmul.mubr.msk.f32.gmra.mrb[6].mxu1 %vm705_vm14, %v3462_v61  ;;  %2355 = vmatmul.mubr.msk.f32.gmra.mrb[38].mxu0 %vm4810_vm15, %v3462_v61  ;;  %vm4815_vm15 = vcmp.eq.s32.totalorder %v3861_v40, %v3683_v34 }
 0x1c3   : > { %3131 = vmatpush3.bf16.msra.mxu1 %v3463_v27  ;;  %3203 = vmatpush3.bf16.msra.mxu0 %v3706_v47 }
 0x1c4   : > { %3205 = vmatprep.subr.bf16.mxu0 %v3740_v11  ;;  %2308 = vmatprep.mubr.msk.f32.mxu1 %vm708_vm11, %v3462_v61 }
 0x1c5   : > { %3132 = vmatprep.subr.bf16.mxu1 %v3463_v27  ;;  %2356 = vmatprep.mubr.msk.f32.mxu0 %vm4813_vm9, %v3462_v61  ;;  %vm4818_vm9 = vcmp.eq.s32.totalorder %v3863_v42, %v3683_v34 }
 0x1c6   : > { %2309 = vmatmul.mubr.msk.f32.gmra.mrb[8].mxu1 %vm707_vm13, %v3462_v61  ;;  %2357 = vmatmul.mubr.msk.f32.gmra.mrb[40].mxu0 %vm4815_vm15, %v3462_v61  ;;  %vm4820_vm15 = vcmp.eq.s32.totalorder %v3897_v46, %v3681_v33 }
 0x1c7   : > { %3133 = vmatpush3.bf16.msra.mxu1 %v3463_v27  ;;  %3207 = vmatpush3.bf16.msra.mxu0 %v3708_v50 }
 0x1c8   : > { %3209 = vmatprep.subr.bf16.mxu0 %v3746_v14  ;;  %2310 = vmatprep.mubr.msk.f32.mxu1 %vm710_vm7, %v3462_v61 }
 0x1c9   : > { %3134 = vmatprep.subr.bf16.mxu1 %v3463_v27  ;;  %2358 = vmatprep.mubr.msk.f32.mxu0 %vm4817_vm5, %v3462_v61  ;;  %vm4822_vm5 = vcmp.eq.s32.totalorder %v3897_v46, %v3683_v34 }
 0x1ca   : > { %2311 = vmatmul.mubr.msk.f32.gmra.mrb[10].mxu1 %vm4818_vm9, %v3462_v61  ;;  %2359 = vmatmul.mubr.msk.f32.gmra.mrb[42].mxu0 %vm4819_vm3, %v3462_v61  ;;  %vm4823_vm9 = vcmp.eq.s32.totalorder %v3929_v28, %v3683_v34  ;;  %vm714_vm3 = vcmp.eq.s32.totalorder %v3931_v49, %v3681_v33 }
 0x1cb   : > { %3135 = vmatpush3.bf16.msra.mxu1 %v3463_v27  ;;  %3211 = vmatpush3.bf16.msra.mxu0 %v3710_v53 }
 0x1cc   : > { %3213 = vmatprep.subr.bf16.mxu0 %v3753_v18  ;;  %2312 = vmatprep.mubr.msk.f32.mxu1 %vm4820_vm15, %v3462_v61  ;;  %vm4824_vm15 = vcmp.eq.s32.totalorder %v3962_v51, %v3681_v33 }
 0x1cd   : > { %3136 = vmatprep.subr.bf16.mxu1 %v3463_v27  ;;  %2360 = vmatprep.mubr.msk.f32.mxu0 %vm4821_vm1, %v3462_v61  ;;  %vm713_vm1 = vcmp.eq.s32.totalorder %v3931_v49, %v3683_v34 }
 0x1ce   : > { %2313 = vmatmul.mubr.msk.f32.gmra.mrb[12].mxu1 %vm4822_vm5, %v3462_v61  ;;  %2361 = vmatmul.mubr.msk.f32.gmra.mrb[44].mxu0 %vm4823_vm9, %v3462_v61  ;;  %vm1035_vm5 = vcmp.eq.s32.totalorder %v3962_v51, %v3683_v34  ;;  %vm1344_vm9 = vcmp.eq.s32.totalorder %v3993_v52, %v3681_v33 }
 0x1cf   : > { %3137 = vmatpush3.bf16.msra.mxu1 %v3463_v27  ;;  %3215 = vmatpush3.bf16.msra.mxu0 %v3712_v56 }
 0x1d0   : > { %3217 = vmatprep.subr.bf16.mxu0 %v3762_v23  ;;  %2314 = vmatprep.mubr.msk.f32.mxu1 %vm714_vm3, %v3462_v61 }
 0x1d1   : > { %3138 = vmatprep.subr.bf16.mxu1 %v3463_v27  ;;  %2362 = vmatprep.mubr.msk.f32.mxu0 %vm4824_vm15, %v3462_v61  ;;  %vm1343_vm15 = vcmp.eq.s32.totalorder %v3993_v52, %v3683_v34 }
 0x1d2   : > { %2315 = vmatmul.mubr.msk.f32.gmra.mrb[14].mxu1 %vm713_vm1, %v3462_v61  ;;  %2363 = vmatmul.mubr.msk.f32.gmra.mrb[46].mxu0 %vm1035_vm5, %v3462_v61 }
 0x1d3   : > { %3139 = vmatpush3.bf16.msra.mxu1 %v3463_v27  ;;  %3219 = vmatpush3.bf16.msra.mxu0 %v3714_v59 }
 0x1d4   : > { %3237 = vmatprep.subr.bf16.mxu0 %v3716_v63  ;;  %2316 = vmatprep.mubr.msk.f32.mxu1 %vm700_vm0, %v3462_v61  ;;  %vm1346_vm0 = vcmp.eq.s32.totalorder %v4031_v54, %v3681_v33 }
 0x1d5   : > { %3172 = vmatprep.subr.bf16.mxu1 %v3463_v27  ;;  %2396 = vmatprep.mubr.msk.f32.mxu0 %vm1344_vm9, %v3462_v61 }
 0x1d6   : > { %2317 = vmatmul.mubr.msk.f32.vlgmr.msra.gmra.mrb[16].mxu1 %vm699_vm2, %v3462_v61  ;;  %2397 = vmatmul.mubr.msk.f32.vlgmr.msra.gmra.mrb[48].mxu0 %vm1343_vm15, %v3462_v61  ;;  %vm1345_vm2 = vcmp.eq.s32.totalorder %v4031_v54, %v3683_v34 }
 0x1d7   : > { %3173 = vmatpush3.bf16.msra.mxu1 %v3463_v27  ;;  %3239 = vmatpush3.bf16.msra.mxu0 %v3700_v38  ;;  %v4083_v38 = vadd.s32 2, %v3795_v30 }
 0x1d8   : > { %3241 = vmatprep.subr.bf16.mxu0 %v3722_v2  ;;  %2318 = vmatprep.mubr.msk.f32.mxu1 %vm702_vm4, %v3462_v61  ;;  %vm1348_vm4 = vcmp.eq.s32.totalorder %v4056_v55, %v3681_v33 }
 0x1d9   : > { %3174 = vmatprep.subr.bf16.mxu1 %v3463_v27  ;;  %2398 = vmatprep.mubr.msk.f32.mxu0 %vm1346_vm0, %v3462_v61 }
 0x1da   : > { %2319 = vmatmul.mubr.msk.f32.gmra.mrb[18].mxu1 %vm701_vm6, %v3462_v61  ;;  %2399 = vmatmul.mubr.msk.f32.gmra.mrb[50].mxu0 %vm1345_vm2, %v3462_v61  ;;  %vm1347_vm6 = vcmp.eq.s32.totalorder %v4056_v55, %v3683_v34 }
 0x1db   : > { %3175 = vmatpush3.bf16.msra.mxu1 %v3463_v27  ;;  %3243 = vmatpush3.bf16.msra.mxu0 %v3702_v41  ;;  %v4110_v41 = vadd.s32 2, %v3829_v37 }
 0x1dc   : > { %3245 = vmatprep.subr.bf16.mxu0 %v3728_v5  ;;  %2320 = vmatprep.mubr.msk.f32.mxu1 %vm704_vm8, %v3462_v61  ;;  %vm1350_vm8 = vcmp.eq.s32.totalorder %v4083_v38, %v3681_v33 }
 0x1dd   : > { %3176 = vmatprep.subr.bf16.mxu1 %v3463_v27  ;;  %2400 = vmatprep.mubr.msk.f32.mxu0 %vm1348_vm4, %v3462_v61 }
 0x1de   : > { %2321 = vmatmul.mubr.msk.f32.gmra.mrb[20].mxu1 %vm703_vm10, %v3462_v61  ;;  %2401 = vmatmul.mubr.msk.f32.gmra.mrb[52].mxu0 %vm1347_vm6, %v3462_v61  ;;  %vm1349_vm10 = vcmp.eq.s32.totalorder %v4083_v38, %v3683_v34 }
 0x1df   : > { %3177 = vmatpush3.bf16.msra.mxu1 %v3463_v27  ;;  %3247 = vmatpush3.bf16.msra.mxu0 %v3704_v44  ;;  %v4137_v44 = vadd.s32 2, %v3863_v42 }
 0x1e0   : > { %3249 = vmatprep.subr.bf16.mxu0 %v3734_v8  ;;  %2322 = vmatprep.mubr.msk.f32.mxu1 %vm706_vm12, %v3462_v61  ;;  %vm1352_vm12 = vcmp.eq.s32.totalorder %v4110_v41, %v3681_v33 }
 0x1e1   : > { %3178 = vmatprep.subr.bf16.mxu1 %v3463_v27  ;;  %2402 = vmatprep.mubr.msk.f32.mxu0 %vm1350_vm8, %v3462_v61 }
 0x1e2   : > { %2323 = vmatmul.mubr.msk.f32.gmra.mrb[22].mxu1 %vm705_vm14, %v3462_v61  ;;  %2403 = vmatmul.mubr.msk.f32.gmra.mrb[54].mxu0 %vm1349_vm10, %v3462_v61  ;;  %vm4826_vm14 = vcmp.eq.s32.totalorder %v4110_v41, %v3683_v34 }
 0x1e3   : > { %3179 = vmatpush3.bf16.msra.mxu1 %v3463_v27  ;;  %3251 = vmatpush3.bf16.msra.mxu0 %v3706_v47  ;;  %v4164_v47 = vadd.s32 2, %v3897_v46 }
 0x1e4   : > { %3253 = vmatprep.subr.bf16.mxu0 %v3740_v11  ;;  %2324 = vmatprep.mubr.msk.f32.mxu1 %vm708_vm11, %v3462_v61  ;;  %vm4825_vm11 = vcmp.eq.s32.totalorder %v4137_v44, %v3681_v33 }
 0x1e5   : > { %3180 = vmatprep.subr.bf16.mxu1 %v3463_v27  ;;  %2404 = vmatprep.mubr.msk.f32.mxu0 %vm1352_vm12, %v3462_v61 }
 0x1e6   : > { %2325 = vmatmul.mubr.msk.f32.gmra.mrb[24].mxu1 %vm707_vm13, %v3462_v61  ;;  %2405 = vmatmul.mubr.msk.f32.gmra.mrb[56].mxu0 %vm4826_vm14, %v3462_v61  ;;  %vm1353_vm13 = vcmp.eq.s32.totalorder %v4137_v44, %v3683_v34  ;;  %vm4827_vm14 = vcmp.eq.s32.totalorder %v4164_v47, %v3681_v33 }
 0x1e7   : > { %3181 = vmatpush3.bf16.msra.mxu1 %v3463_v27  ;;  %3255 = vmatpush3.bf16.msra.mxu0 %v3708_v50  ;;  %v4191_v50 = vadd.s32 2, %v3931_v49 }
 0x1e8   : > { %3257 = vmatprep.subr.bf16.mxu0 %v3746_v14  ;;  %2326 = vmatprep.mubr.msk.f32.mxu1 %vm710_vm7, %v3462_v61  ;;  %vm4845_vm7 = vcmp.eq.s32.totalorder %v3863_v42, %v3683_v34 }
 0x1e9   : > { %3182 = vmatprep.subr.bf16.mxu1 %v3463_v27  ;;  %2406 = vmatprep.mubr.msk.f32.mxu0 %vm4825_vm11, %v3462_v61  ;;  %vm4846_vm11 = vcmp.eq.s32.totalorder %v3897_v46, %v3681_v33 }
 0x1ea   : > { %2327 = vmatmul.mubr.msk.f32.gmra.mrb[26].mxu1 %vm4845_vm7, %v3462_v61  ;;  %2407 = vmatmul.mubr.msk.f32.gmra.mrb[58].mxu0 %vm1353_vm13, %v3462_v61  ;;  %vm1355_vm7 = vcmp.eq.s32.totalorder %v4164_v47, %v3683_v34 }
 0x1eb   : > { %3183 = vmatpush3.bf16.msra.mxu1 %v3463_v27  ;;  %3259 = vmatpush3.bf16.msra.mxu0 %v3710_v53  ;;  %v4218_v53 = vadd.s32 3, %v3678_v31  ;;  %v4238_v31 = vadd.s32 3, %v3757_v20 }
 0x1ec   : > { %3261 = vmatprep.subr.bf16.mxu0 %v3753_v18  ;;  %2328 = vmatprep.mubr.msk.f32.mxu1 %vm4846_vm11, %v3462_v61  ;;  %vm4847_vm11 = vcmp.eq.s32.totalorder %v3897_v46, %v3683_v34 }
 0x1ed   : > { %3184 = vmatprep.subr.bf16.mxu1 %v3463_v27  ;;  %2408 = vmatprep.mubr.msk.f32.mxu0 %vm4827_vm14, %v3462_v61  ;;  %vm4829_vm14 = vcmp.eq.s32.totalorder %v4191_v50, %v3681_v33 }
 0x1ee   : > { %2329 = vmatmul.mubr.msk.f32.gmra.mrb[28].mxu1 %vm4847_vm11, %v3462_v61  ;;  %2409 = vmatmul.mubr.msk.f32.gmra.mrb[60].mxu0 %vm1355_vm7, %v3462_v61  ;;  %vm4828_vm11 = vcmp.eq.s32.totalorder %v4191_v50, %v3683_v34 }
 0x1ef   : > { %3185 = vmatpush3.bf16.msra.mxu1 %v3463_v27  ;;  %3263 = vmatpush3.bf16.msra.mxu0 %v3712_v56  ;;  %v4269_v56 = vadd.s32 3, %v3769_v25 }
 0x1f0   : > { %3265 = vmatprep.subr.bf16.mxu0 %v3762_v23  ;;  %2330 = vmatprep.mubr.msk.f32.mxu1 %vm714_vm3, %v3462_v61  ;;  %vm4848_vm3 = vcmp.eq.s32.totalorder %v3686_v35, %v3681_v33 }
 0x1f1   : > { %3186 = vmatprep.subr.bf16.mxu1 %v3463_v27  ;;  %2410 = vmatprep.mubr.msk.f32.mxu0 %vm4829_vm14, %v3462_v61  ;;  %vm4849_vm14 = vcmp.eq.s32.totalorder %v3686_v35, %v3683_v34  ;;  %v4294_v35 = vadd.s32 3, %v3795_v30 }
 0x1f2   : > { %2331 = vmatmul.mubr.msk.f32.gmra.mrb[30].mxu1 %vm713_vm1, %v3462_v61  ;;  %2411 = vmatmul.mubr.msk.f32.gmra.mrb[62].mxu0 %vm4828_vm11, %v3462_v61  ;;  %vm4830_vm1 = vcmp.eq.s32.totalorder %v4218_v53, %v3681_v33  ;;  %vm4831_vm11 = vcmp.eq.s32.totalorder %v4218_v53, %v3683_v34 }
 0x1f3   : > { %3187 = vmatpush3.bf16.msra.mxu1 %v3463_v27  ;;  %3267 = vmatpush3.bf16.msra.mxu0 %v3714_v59  ;;  %v4369_v59 = vadd.s32 3, %v3897_v46 }
 0x1f4   : > { %2364 = vmatprep.mubr.msk.f32.mxu1 %vm4848_vm3, %v3462_v61  ;;  %3220 = vmatprep.subr.bf16.mxu1 %v3463_v27  ;;  %vm4850_vm3 = vcmp.eq.s32.totalorder %v3767_v24, %v3681_v33 }
 0x1f5   : > { %2444 = vmatprep.mubr.msk.f32.mxu0 %vm4830_vm1, %v3462_v61  ;;  %vm4832_vm1 = vcmp.eq.s32.totalorder %v4238_v31, %v3681_v33 }
 0x1f6   : > { %2365 = vmatmul.mubr.msk.f32.vlgmr.msra.gmra.mrb[32].mxu1 %vm4849_vm14, %v3462_v61  ;;  %2445 = vmatmul.mubr.msk.f32.vlgmr.msra.gmra.mrb[64].mxu0 %vm4831_vm11, %v3462_v61  ;;  %vm4833_vm14 = vcmp.eq.s32.totalorder %v4238_v31, %v3683_v34  ;;  %vm4852_vm11 = vcmp.eq.s32.totalorder %v3793_v29, %v3681_v33 }
 0x1f7   : > { %3221 = vmatpush3.bf16.msra.mxu1 %v3463_v27  ;;  %2366 = vmatprep.mubr.msk.f32.mxu1 %vm4850_vm3, %v3462_v61  ;;  %vm4851_vm3 = vcmp.eq.s32.totalorder %v3767_v24, %v3683_v34 }
 0x1f8   : > { %3222 = vmatprep.subr.bf16.mxu1 %v3463_v27  ;;  %2446 = vmatprep.mubr.msk.f32.mxu0 %vm4832_vm1, %v3462_v61  ;;  %vm4834_vm1 = vcmp.eq.s32.totalorder %v4269_v56, %v3681_v33 }
 0x1fa   : > { %2367 = vmatmul.mubr.msk.f32.gmra.mrb[34].mxu1 %vm4851_vm3, %v3462_v61  ;;  %2447 = vmatmul.mubr.msk.f32.gmra.mrb[66].mxu0 %vm4833_vm14, %v3462_v61  ;;  %vm4835_vm3 = vcmp.eq.s32.totalorder %v4269_v56, %v3683_v34  ;;  %vm4854_vm14 = vcmp.eq.s32.totalorder %v3827_v36, %v3681_v33 }
 0x1fb   : > { %3223 = vmatpush3.bf16.msra.mxu1 %v3463_v27  ;;  %2368 = vmatprep.mubr.msk.f32.mxu1 %vm4852_vm11, %v3462_v61  ;;  %vm4853_vm11 = vcmp.eq.s32.totalorder %v3793_v29, %v3683_v34 }
 0x1fc   : > { %3224 = vmatprep.subr.bf16.mxu1 %v3463_v27  ;;  %2448 = vmatprep.mubr.msk.f32.mxu0 %vm4834_vm1, %v3462_v61  ;;  %vm4836_vm1 = vcmp.eq.s32.totalorder %v4294_v35, %v3681_v33 }
 0x1fe   : > { %2369 = vmatmul.mubr.msk.f32.gmra.mrb[36].mxu1 %vm4853_vm11, %v3462_v61  ;;  %2449 = vmatmul.mubr.msk.f32.gmra.mrb[68].mxu0 %vm4835_vm3, %v3462_v61  ;;  %vm4837_vm11 = vcmp.eq.s32.totalorder %v4294_v35, %v3683_v34  ;;  %vm4856_vm3 = vcmp.eq.s32.totalorder %v3861_v40, %v3681_v33 }
 0x1ff   : > { %3225 = vmatpush3.bf16.msra.mxu1 %v3463_v27  ;;  %2370 = vmatprep.mubr.msk.f32.mxu1 %vm4854_vm14, %v3462_v61  ;;  %vm4855_vm14 = vcmp.eq.s32.totalorder %v3827_v36, %v3683_v34 }
 0x200   : > { %3226 = vmatprep.subr.bf16.mxu1 %v3463_v27  ;;  %2450 = vmatprep.mubr.msk.f32.mxu0 %vm4836_vm1, %v3462_v61  ;;  %vm4838_vm1 = vcmp.eq.s32.totalorder %v4319_v57, %v3681_v33 }
 0x202   : > { %2371 = vmatmul.mubr.msk.f32.gmra.mrb[38].mxu1 %vm4855_vm14, %v3462_v61  ;;  %2451 = vmatmul.mubr.msk.f32.gmra.mrb[70].mxu0 %vm4837_vm11, %v3462_v61  ;;  %vm4839_vm14 = vcmp.eq.s32.totalorder %v4319_v57, %v3683_v34  ;;  %vm4858_vm11 = vcmp.eq.s32.totalorder %v3895_v45, %v3681_v33 }
 0x203   : > { %3227 = vmatpush3.bf16.msra.mxu1 %v3463_v27  ;;  %2372 = vmatprep.mubr.msk.f32.mxu1 %vm4856_vm3, %v3462_v61  ;;  %vm4857_vm3 = vcmp.eq.s32.totalorder %v3861_v40, %v3683_v34 }
 0x204   : > { %3228 = vmatprep.subr.bf16.mxu1 %v3463_v27  ;;  %2452 = vmatprep.mubr.msk.f32.mxu0 %vm4838_vm1, %v3462_v61  ;;  %vm4840_vm1 = vcmp.eq.s32.totalorder %v4344_v58, %v3681_v33 }
 0x206   : > { %2373 = vmatmul.mubr.msk.f32.gmra.mrb[40].mxu1 %vm4857_vm3, %v3462_v61  ;;  %2453 = vmatmul.mubr.msk.f32.gmra.mrb[72].mxu0 %vm4839_vm14, %v3462_v61  ;;  %vm4841_vm3 = vcmp.eq.s32.totalorder %v4344_v58, %v3683_v34  ;;  %vm4860_vm14 = vcmp.eq.s32.totalorder %v3929_v28, %v3681_v33 }
 0x207   : > { %3229 = vmatpush3.bf16.msra.mxu1 %v3463_v27  ;;  %2374 = vmatprep.mubr.msk.f32.mxu1 %vm4858_vm11, %v3462_v61  ;;  %vm4859_vm11 = vcmp.eq.s32.totalorder %v3895_v45, %v3683_v34 }
 0x208   : > { %3230 = vmatprep.subr.bf16.mxu1 %v3463_v27  ;;  %2454 = vmatprep.mubr.msk.f32.mxu0 %vm4840_vm1, %v3462_v61  ;;  %vm4842_vm1 = vcmp.eq.s32.totalorder %v4369_v59, %v3681_v33 }
 0x20a   : > { %2375 = vmatmul.mubr.msk.f32.gmra.mrb[42].mxu1 %vm4859_vm11, %v3462_v61  ;;  %2455 = vmatmul.mubr.msk.f32.gmra.mrb[74].mxu0 %vm4841_vm3, %v3462_v61  ;;  %vm1677_vm11 = vcmp.eq.s32.totalorder %v4369_v59, %v3683_v34  ;;  %vm4862_vm3 = vcmp.eq.s32.totalorder %v3962_v51, %v3681_v33 }
 0x20b   : > { %3231 = vmatpush3.bf16.msra.mxu1 %v3463_v27  ;;  %2376 = vmatprep.mubr.msk.f32.mxu1 %vm4860_vm14, %v3462_v61  ;;  %vm4861_vm14 = vcmp.eq.s32.totalorder %v3929_v28, %v3683_v34 }
 0x20c   : > { %3232 = vmatprep.subr.bf16.mxu1 %v3463_v27  ;;  %2456 = vmatprep.mubr.msk.f32.mxu0 %vm4842_vm1, %v3462_v61  ;;  %vm1680_vm1 = vcmp.eq.s32.totalorder %v4394_v60, %v3681_v33 }
 0x20e   : > { %2377 = vmatmul.mubr.msk.f32.gmra.mrb[44].mxu1 %vm4861_vm14, %v3462_v61  ;;  %2457 = vmatmul.mubr.msk.f32.gmra.mrb[76].mxu0 %vm1677_vm11, %v3462_v61  ;;  %vm1679_vm14 = vcmp.eq.s32.totalorder %v4394_v60, %v3683_v34 }
 0x20f   : > { %3233 = vmatpush3.bf16.msra.mxu1 %v3463_v27  ;;  %2378 = vmatprep.mubr.msk.f32.mxu1 %vm4862_vm3, %v3462_v61  ;;  %vm4875_vm3 = vcmp.eq.s32.totalorder %v4294_v35, %v3683_v34 }
 0x210   : > { %3234 = vmatprep.subr.bf16.mxu1 %v3463_v27  ;;  %2458 = vmatprep.mubr.msk.f32.mxu0 %vm1680_vm1, %v3462_v61 }
 0x212   : > { %2379 = vmatmul.mubr.msk.f32.gmra.mrb[46].mxu1 %vm1035_vm5, %v3462_v61  ;;  %2459 = vmatmul.mubr.msk.f32.gmra.mrb[78].mxu0 %vm1679_vm14, %v3462_v61  ;;  %vm4863_vm5 = vcmp.eq.s32.totalorder %v4110_v41, %v3683_v34 }
 0x213   : > { %3235 = vmatpush3.bf16.msra.mxu1 %v3463_v27  ;;  %2412 = vmatprep.mubr.msk.f32.mxu1 %vm1344_vm9, %v3462_v61  ;;  %vm4864_vm9 = vcmp.eq.s32.totalorder %v4137_v44, %v3681_v33 }
 0x214   : > { %3268 = vmatprep.subr.bf16.mxu1 %v3463_v27 }
 0x216   : > { %2413 = vmatmul.mubr.msk.f32.vlgmr.msra.gmra.mrb[48].mxu1 %vm1343_vm15, %v3462_v61  ;;  %vm4865_vm15 = vcmp.eq.s32.totalorder %v4164_v47, %v3681_v33 }
 0x217   : > { %3269 = vmatpush3.bf16.msra.mxu1 %v3463_v27  ;;  %2414 = vmatprep.mubr.msk.f32.mxu1 %vm1346_vm0, %v3462_v61  ;;  %vm4866_vm0 = vcmp.eq.s32.totalorder %v4191_v50, %v3681_v33 }
 0x218   : > { %3270 = vmatprep.subr.bf16.mxu1 %v3463_v27 }
 0x21a   : > { %2415 = vmatmul.mubr.msk.f32.gmra.mrb[50].mxu1 %vm1345_vm2, %v3462_v61  ;;  %vm4867_vm2 = vcmp.eq.s32.totalorder %v4191_v50, %v3683_v34 }
 0x21b   : > { %3271 = vmatpush3.bf16.msra.mxu1 %v3463_v27  ;;  %2416 = vmatprep.mubr.msk.f32.mxu1 %vm1348_vm4, %v3462_v61  ;;  %vm4868_vm4 = vcmp.eq.s32.totalorder %v4218_v53, %v3681_v33 }
 0x21c   : > { %3272 = vmatprep.subr.bf16.mxu1 %v3463_v27 }
 0x21e   : > { %2417 = vmatmul.mubr.msk.f32.gmra.mrb[52].mxu1 %vm1347_vm6, %v3462_v61  ;;  %vm4869_vm6 = vcmp.eq.s32.totalorder %v4218_v53, %v3683_v34 }
 0x21f   : > { %3273 = vmatpush3.bf16.msra.mxu1 %v3463_v27  ;;  %2418 = vmatprep.mubr.msk.f32.mxu1 %vm1350_vm8, %v3462_v61  ;;  %vm4870_vm8 = vcmp.eq.s32.totalorder %v4238_v31, %v3681_v33 }
 0x220   : > { %3274 = vmatprep.subr.bf16.mxu1 %v3463_v27 }
 0x222   : > { %2419 = vmatmul.mubr.msk.f32.gmra.mrb[54].mxu1 %vm1349_vm10, %v3462_v61  ;;  %vm4871_vm10 = vcmp.eq.s32.totalorder %v4238_v31, %v3683_v34 }
 0x223   : > { %3275 = vmatpush3.bf16.msra.mxu1 %v3463_v27  ;;  %2420 = vmatprep.mubr.msk.f32.mxu1 %vm1352_vm12, %v3462_v61  ;;  %vm4872_vm12 = vcmp.eq.s32.totalorder %v4269_v56, %v3681_v33 }
 0x224   : > { %3276 = vmatprep.subr.bf16.mxu1 %v3463_v27 }
 0x226   : > { %2421 = vmatmul.mubr.msk.f32.gmra.mrb[56].mxu1 %vm4863_vm5, %v3462_v61  ;;  %vm4876_vm5 = vcmp.eq.s32.totalorder %v4319_v57, %v3681_v33 }
 0x227   : > { %3277 = vmatpush3.bf16.msra.mxu1 %v3463_v27  ;;  %2422 = vmatprep.mubr.msk.f32.mxu1 %vm4864_vm9, %v3462_v61  ;;  %vm4877_vm9 = vcmp.eq.s32.totalorder %v4319_v57, %v3683_v34 }
 0x228   : > { %3278 = vmatprep.subr.bf16.mxu1 %v3463_v27 }
 0x22a   : > { %2423 = vmatmul.mubr.msk.f32.gmra.mrb[58].mxu1 %vm1353_vm13, %v3462_v61  ;;  %vm4873_vm13 = vcmp.eq.s32.totalorder %v4269_v56, %v3683_v34 }
 0x22b   : > { %3279 = vmatpush3.bf16.msra.mxu1 %v3463_v27  ;;  %2424 = vmatprep.mubr.msk.f32.mxu1 %vm4865_vm15, %v3462_v61  ;;  %vm4878_vm15 = vcmp.eq.s32.totalorder %v4344_v58, %v3681_v33 }
 0x22c   : > { %3280 = vmatprep.subr.bf16.mxu1 %v3463_v27 }
 0x22e   : > { %2425 = vmatmul.mubr.msk.f32.gmra.mrb[60].mxu1 %vm1355_vm7, %v3462_v61  ;;  %vm4874_vm7 = vcmp.eq.s32.totalorder %v4294_v35, %v3681_v33 }
 0x22f   : > { %3281 = vmatpush3.bf16.msra.mxu1 %v3463_v27  ;;  %2426 = vmatprep.mubr.msk.f32.mxu1 %vm4866_vm0, %v3462_v61  ;;  %vm4879_vm0 = vcmp.eq.s32.totalorder %v4344_v58, %v3683_v34 }
 0x230   : > { %3282 = vmatprep.subr.bf16.mxu1 %v3463_v27 }
 0x232   : > { %2427 = vmatmul.mubr.msk.f32.gmra.mrb[62].mxu1 %vm4867_vm2, %v3462_v61  ;;  %vm4880_vm2 = vcmp.eq.s32.totalorder %v4369_v59, %v3681_v33 }
 0x233   : > { %3283 = vmatpush3.bf16.msra.mxu1 %v3463_v27  ;;  %2460 = vmatprep.mubr.msk.f32.mxu1 %vm4868_vm4, %v3462_v61 }
 0x236   : > { %2461 = vmatmul.mubr.msk.f32.vlgmr.msra.gmra.mrb[64].mxu1 %vm4869_vm6, %v3462_v61 }
 0x237   : > { %2462 = vmatprep.mubr.msk.f32.mxu1 %vm4870_vm8, %v3462_v61 }
 0x23a   : > { %2463 = vmatmul.mubr.msk.f32.gmra.mrb[66].mxu1 %vm4871_vm10, %v3462_v61 }
 0x23b   : > { %2464 = vmatprep.mubr.msk.f32.mxu1 %vm4872_vm12, %v3462_v61 }
 0x23e   : > { %2465 = vmatmul.mubr.msk.f32.gmra.mrb[68].mxu1 %vm4873_vm13, %v3462_v61 }
 0x23f   : > { %2466 = vmatprep.mubr.msk.f32.mxu1 %vm4874_vm7, %v3462_v61 }
 0x242   : > { %2467 = vmatmul.mubr.msk.f32.gmra.mrb[70].mxu1 %vm4875_vm3, %v3462_v61 }
 0x243   : > { %2468 = vmatprep.mubr.msk.f32.mxu1 %vm4876_vm5, %v3462_v61 }
 0x246   : > { %2469 = vmatmul.mubr.msk.f32.gmra.mrb[72].mxu1 %vm4877_vm9, %v3462_v61 }
 0x247   : > { %2470 = vmatprep.mubr.msk.f32.mxu1 %vm4878_vm15, %v3462_v61 }
 0x24a   : > { %2471 = vmatmul.mubr.msk.f32.gmra.mrb[74].mxu1 %vm4879_vm0, %v3462_v61 }
 0x24b   : > { %2472 = vmatprep.mubr.msk.f32.mxu1 %vm4880_vm2, %v3462_v61 }
 0x24e   : > { %2473 = vmatmul.mubr.msk.f32.gmra.mrb[76].mxu1 %vm1677_vm11, %v3462_v61  ;;  %vm2084_vm11 = vcmask 523264  }
 0x24f   : > { %2474 = vmatprep.mubr.msk.f32.mxu1 %vm1680_vm1, %v3462_v61  ;;  %vm2075_vm1 = vcmask 261120  }
 0x252   : > { %2475 = vmatmul.mubr.msk.f32.gmra.mrb[78].mxu1 %vm1679_vm14, %v3462_v61  ;;  %vm2093_vm14 = vcmask 785408  }
 0x289   : > { %v2564_v62 = vpop.f32.mrb[0].mxu1 }
 0x28a   : > { %v2565_v63 = vpop.f32.mrb[1].mxu1 }
 0x28b   : > { %v4578_v0 = vadd.f32 %v2565_v63, %v2564_v62 }
 0x28d   : > { %v2567_v1 = vpop.f32.mrb[2].mxu1 }
 0x28e   : > { %v2568_v2 = vpop.f32.mrb[3].mxu1 }
 0x28f   : > { %v4580_v3 = vadd.f32 %v2568_v2, %v2567_v1  ;;  %v2676_v2 = vpop.f32.mrb[32].mxu0 }
 0x291   : > { %v2570_v4 = vpop.f32.mrb[4].mxu1 }
 0x292   : > { %v2571_v5 = vpop.f32.mrb[5].mxu1 }
 0x293   : > { %v4582_v6 = vadd.f32 %v2571_v5, %v2570_v4 }
 0x295   : > { %v2573_v7 = vpop.f32.mrb[6].mxu1 }
 0x296   : > { %v2574_v33 = vpop.f32.mrb[7].mxu1 }
 0x297   : > { %v4584_v8 = vadd.f32 %v2574_v33, %v2573_v7  ;;  %v2677_v33 = vpop.f32.mrb[33].mxu0 }
 0x299   : > { %v2576_v9 = vpop.f32.mrb[8].mxu1 }
 0x29a   : > { %v2577_v10 = vpop.f32.mrb[9].mxu1 }
 0x29b   : > { %v4586_v34 = vadd.f32 %v2577_v10, %v2576_v9  ;;  %v4594_v10 = vadd.f32 %v2677_v33, %v2676_v2 }
 0x29d   : > { %v2579_v61 = vpop.f32.mrb[10].mxu1 }
 0x29e   : > { %v2580_v11 = vpop.f32.mrb[11].mxu1 }
 0x29f   : > { %v4588_v12 = vadd.f32 %v2580_v11, %v2579_v61 }
 0x2a1   : > { %v2582_v13 = vpop.f32.mrb[12].mxu1 }
 0x2a2   : > { %v2583_v14 = vpop.f32.mrb[13].mxu1 }
 0x2a3   : > { %v4590_v15 = vadd.f32 %v2583_v14, %v2582_v13  ;;  %v2679_v13 = vpop.f32.mrb[34].mxu0 }
 0x2a5   : > { %v2585_v16 = vpop.f32.mrb[14].mxu1 }
 0x2a6   : > { %v2586_v17 = vpop.f32.mrb[15].mxu1 }
 0x2a7   : > { %v4592_v18 = vadd.f32 %v2586_v17, %v2585_v16  ;;  %v2680_v16 = vpop.f32.mrb[35].mxu0 }
 0x2a9   : > { %v2620_v19 = vpop.f32.mrb[16].mxu1 }
 0x2aa   : > { %v2621_v20 = vpop.f32.mrb[17].mxu1 }
 0x2ab   : > { %v2622_v21 = vadd.f32 %v2621_v20, %v2620_v19  ;;  %v4596_v19 = vadd.f32 %v2680_v16, %v2679_v13 }
 0x2ad   : > { %v919_v22 = vadd.f32 1e-06, %v2622_v21  ;;  %v2623_v23 = vpop.f32.mrb[18].mxu1 }
 0x2ae   : > { %v2624_v24 = vpop.f32.mrb[19].mxu1 }
 0x2af   : > { %v2625_v25 = vadd.f32 %v2624_v24, %v2623_v23  ;;  %959 = vperm.xlu0 %3331, %v919_v22   ;;  %v2682_v22 = vpop.f32.mrb[36].mxu0 }
 0x2b0   : > { %v2683_v24 = vpop.f32.mrb[37].mxu0 }
 0x2b1   : > { %v924_v26 = vadd.f32 1e-06, %v2625_v25  ;;  %v2626_v27 = vpop.f32.mrb[20].mxu1 }
 0x2b2   : > { %v2627_v29 = vpop.f32.mrb[21].mxu1 }
 0x2b3   : > { %v2628_v30 = vadd.f32 %v2627_v29, %v2626_v27  ;;  %964 = vperm.xlu1 %3332, %v924_v26   ;;  %v4598_v26 = vadd.f32 %v2683_v24, %v2682_v22 }
 0x2b5   : > { %v929_v32 = vadd.f32 1e-06, %v2628_v30  ;;  %v2629_v36 = vpop.f32.mrb[22].mxu1  ;;  %v2685_v30 = vpop.f32.mrb[38].mxu0 }
 0x2b6   : > { %v2630_v37 = vpop.f32.mrb[23].mxu1 }
 0x2b7   : > { %v2631_v39 = vadd.f32 %v2630_v37, %v2629_v36  ;;  %969 = vperm.xlu0 %3331, %v929_v32   ;;  %v2686_v36 = vpop.f32.mrb[39].mxu0 }
 0x2b9   : > { %v934_v40 = vadd.f32 1e-06, %v2631_v39  ;;  %v2632_v42 = vpop.f32.mrb[24].mxu1  ;;  %v4600_v39 = vadd.f32 %v2686_v36, %v2685_v30 }
 0x2ba   : > { %v2633_v43 = vpop.f32.mrb[25].mxu1 }
 0x2bb   : > { %v2634_v45 = vadd.f32 %v2633_v43, %v2632_v42  ;;  %974 = vperm.xlu1 %3332, %v934_v40   ;;  %v2688_v43 = vpop.f32.mrb[40].mxu0 }
 0x2bd   : > { %v939_v46 = vadd.f32 1e-06, %v2634_v45  ;;  %v2635_v48 = vpop.f32.mrb[26].mxu1 }
 0x2be   : > { %v2636_v28 = vpop.f32.mrb[27].mxu1 }
 0x2bf   : > { %v2637_v49 = vadd.f32 %v2636_v28, %v2635_v48  ;;  %979 = vperm.xlu0 %3331, %v939_v46   ;;  %v2689_v46 = vpop.f32.mrb[41].mxu0 }
 0x2c0   : > { %v4602_v28 = vadd.f32 %v2689_v46, %v2688_v43 }
 0x2c1   : > { %v944_v51 = vadd.f32 1e-06, %v2637_v49  ;;  %v2638_v52 = vpop.f32.mrb[28].mxu1 }
 0x2c2   : > { %v2639_v54 = vpop.f32.mrb[29].mxu1 }
 0x2c3   : > { %v2640_v55 = vadd.f32 %v2639_v54, %v2638_v52  ;;  %984 = vperm.xlu1 %3332, %v944_v51   ;;  %v2691_v52 = vpop.f32.mrb[42].mxu0 }
 0x2c5   : > { %v949_v38 = vadd.f32 1e-06, %v2640_v55  ;;  %v2641_v41 = vpop.f32.mrb[30].mxu1  ;;  %v2692_v55 = vpop.f32.mrb[43].mxu0 }
 0x2c6   : > { %v2642_v44 = vpop.f32.mrb[31].mxu1 }
 0x2c7   : > { %v2643_v47 = vadd.f32 %v2642_v44, %v2641_v41  ;;  %989 = vperm.xlu0 %3331, %v949_v38   ;;  %v4604_v41 = vadd.f32 %v2692_v55, %v2691_v52 }
 0x2c9   : > { %v954_v50 = vadd.f32 1e-06, %v2643_v47  ;;  %v2732_v53 = vpop.f32.mrb[32].mxu1 }
 0x2ca   : > { %v2733_v31 = vpop.f32.mrb[33].mxu1 }
 0x2cb   : > { %v2734_v56 = vadd.f32 %v2733_v31, %v2732_v53  ;;  %994 = vperm.xlu1 %3332, %v954_v50   ;;  %v2694_v50 = vpop.f32.mrb[44].mxu0 }
 0x2cc   : > { %v2695_v31 = vpop.f32.mrb[45].mxu0 }
 0x2cd   : > { %v1241_v35 = vadd.f32 1e-06, %v2734_v56  ;;  %v2735_v57 = vpop.f32.mrb[34].mxu1 }
 0x2ce   : > { %v2736_v58 = vpop.f32.mrb[35].mxu1 }
 0x2cf   : > { %v2737_v59 = vadd.f32 %v2736_v58, %v2735_v57  ;;  %1281 = vperm.xlu0 %3331, %v1241_v35   ;;  %v4606_v35 = vadd.f32 %v2695_v31, %v2694_v50 }
 0x2d1   : > { %v1246_v60 = vadd.f32 1e-06, %v2737_v59  ;;  %v2738_v62 = vpop.f32.mrb[36].mxu1  ;;  %v2697_v59 = vpop.f32.mrb[46].mxu0 }
 0x2d2   : > { %v2739_v63 = vpop.f32.mrb[37].mxu1 }
 0x2d3   : > { %v2740_v1 = vadd.f32 %v2739_v63, %v2738_v62  ;;  %1286 = vperm.xlu1 %3332, %v1246_v60   ;;  %v2698_v62 = vpop.f32.mrb[47].mxu0 }
 0x2d5   : > { %v1251_v4 = vadd.f32 1e-06, %v2740_v1  ;;  %v2741_v5 = vpop.f32.mrb[38].mxu1  ;;  %v4608_v1 = vadd.f32 %v2698_v62, %v2697_v59 }
 0x2d6   : > { %v2742_v7 = vpop.f32.mrb[39].mxu1 }
 0x2d7   : > { %v2743_v9 = vadd.f32 %v2742_v7, %v2741_v5  ;;  %1291 = vperm.xlu0 %3331, %v1251_v4   ;;  %v2788_v5 = vpop.f32.mrb[48].mxu0 }
 0x2d8   : > { %v2789_v33 = vpop.f32.mrb[49].mxu0 }
 0x2d9   : > { %v1256_v61 = vadd.f32 1e-06, %v2743_v9  ;;  %v2744_v11 = vpop.f32.mrb[40].mxu1 }
 0x2da   : > { %v2745_v14 = vpop.f32.mrb[41].mxu1 }
 0x2db   : > { %v2746_v17 = vadd.f32 %v2745_v14, %v2744_v11  ;;  %1296 = vperm.xlu1 %3332, %v1256_v61   ;;  %v4610_v61 = vadd.f32 %v2789_v33, %v2788_v5  ;;  %v2791_v14 = vpop.f32.mrb[50].mxu0 }
 0x2dd   : > { %v1261_v20 = vadd.f32 1e-06, %v2746_v17  ;;  %v2747_v21 = vpop.f32.mrb[42].mxu1  ;;  %v2792_v17 = vpop.f32.mrb[51].mxu0 }
 0x2de   : > { %v2748_v23 = vpop.f32.mrb[43].mxu1  ;;  %v2794_v24 = vpop.f32.mrb[52].mxu0 }
 0x2df   : > { %v2749_v25 = vadd.f32 %v2748_v23, %v2747_v21  ;;  %1301 = vperm.xlu0 %3331, %v1261_v20   ;;  %v4612_v21 = vadd.f32 %v2792_v17, %v2791_v14 }
 0x2e1   : > { %v1266_v27 = vadd.f32 1e-06, %v2749_v25  ;;  %v2750_v29 = vpop.f32.mrb[44].mxu1 }
 0x2e2   : > { %v2751_v32 = vpop.f32.mrb[45].mxu1 }
 0x2e3   : > { %v2752_v37 = vadd.f32 %v2751_v32, %v2750_v29  ;;  %1306 = vperm.xlu1 %3332, %v1266_v27   ;;  %v2795_v27 = vpop.f32.mrb[53].mxu0 }
 0x2e4   : > { %v4614_v30 = vadd.f32 %v2795_v27, %v2794_v24 }
 0x2e5   : > { %v1271_v40 = vadd.f32 1e-06, %v2752_v37  ;;  %v2753_v42 = vpop.f32.mrb[46].mxu1  ;;  %v2797_v37 = vpop.f32.mrb[54].mxu0 }
 0x2e6   : > { %v2754_v45 = vpop.f32.mrb[47].mxu1 }
 0x2e7   : > { %v2755_v48 = vadd.f32 %v2754_v45, %v2753_v42  ;;  %1311 = vperm.xlu0 %3331, %v1271_v40   ;;  %v2798_v42 = vpop.f32.mrb[55].mxu0 }
 0x2e8   : > { %v4616_v45 = vadd.f32 %v2798_v42, %v2797_v37 }
 0x2e9   : > { %v1276_v49 = vadd.f32 1e-06, %v2755_v48  ;;  %v2844_v51 = vpop.f32.mrb[48].mxu1 }
 0x2ea   : > { %v2845_v54 = vpop.f32.mrb[49].mxu1 }
 0x2eb   : > { %v2846_v38 = vadd.f32 %v2845_v54, %v2844_v51  ;;  %1316 = vperm.xlu1 %3332, %v1276_v49   ;;  %v2800_v49 = vpop.f32.mrb[56].mxu0 }
 0x2ec   : > { %v2801_v52 = vpop.f32.mrb[57].mxu0 }
 0x2ed   : > { %v1563_v44 = vadd.f32 1e-06, %v2846_v38  ;;  %v2847_v47 = vpop.f32.mrb[50].mxu1  ;;  %v4618_v55 = vadd.f32 %v2801_v52, %v2800_v49 }
 0x2ee   : > { %v2848_v53 = vpop.f32.mrb[51].mxu1 }
 0x2ef   : > { %v2849_v56 = vadd.f32 %v2848_v53, %v2847_v47  ;;  %1603 = vperm.xlu0 %3331, %v1563_v44   ;;  %v2803_v47 = vpop.f32.mrb[58].mxu0 }
 0x2f0   : > { %v2804_v53 = vpop.f32.mrb[59].mxu0 }
 0x2f1   : > { %v1568_v57 = vadd.f32 1e-06, %v2849_v56  ;;  %v2850_v58 = vpop.f32.mrb[52].mxu1  ;;  %v4620_v56 = vadd.f32 %v2804_v53, %v2803_v47  ;;  %v2806_v59 = vpop.f32.mrb[60].mxu0 }
 0x2f2   : > { %v2851_v60 = vpop.f32.mrb[53].mxu1  ;;  %v2807_v62 = vpop.f32.mrb[61].mxu0 }
 0x2f3   : > { %v2852_v63 = vadd.f32 %v2851_v60, %v2850_v58  ;;  %1608 = vperm.xlu1 %3332, %v1568_v57  }
 0x2f5   : > { %v1573_v2 = vadd.f32 1e-06, %v2852_v63  ;;  %v2853_v4 = vpop.f32.mrb[54].mxu1 }
 0x2f6   : > { %v2854_v7 = vpop.f32.mrb[55].mxu1 }
 0x2f7   : > { %v2855_v9 = vadd.f32 %v2854_v7, %v2853_v4  ;;  %1613 = vperm.xlu0 %3331, %v1573_v2   ;;  %v4622_v2 = vadd.f32 %v2807_v62, %v2806_v59  ;;  %v2809_v7 = vpop.f32.mrb[62].mxu0 }
 0x2f9   : > { %v1578_v11 = vadd.f32 1e-06, %v2855_v9  ;;  %v2856_v13 = vpop.f32.mrb[56].mxu1  ;;  %v2810_v9 = vpop.f32.mrb[63].mxu0 }
 0x2fa   : > { %v2857_v16 = vpop.f32.mrb[57].mxu1  ;;  %v2900_v17 = vpop.f32.mrb[64].mxu0 }
 0x2fb   : > { %v2858_v20 = vadd.f32 %v2857_v16, %v2856_v13  ;;  %1618 = vperm.xlu1 %3332, %v1578_v11   ;;  %v4624_v13 = vadd.f32 %v2810_v9, %v2809_v7 }
 0x2fd   : > { %v1583_v22 = vadd.f32 1e-06, %v2858_v20  ;;  %v2859_v23 = vpop.f32.mrb[58].mxu1 }
 0x2fe   : > { %v2860_v25 = vpop.f32.mrb[59].mxu1 }
 0x2ff   : > { %v2861_v29 = vadd.f32 %v2860_v25, %v2859_v23  ;;  %1623 = vperm.xlu0 %3331, %v1583_v22   ;;  %v2901_v22 = vpop.f32.mrb[65].mxu0 }
 0x300   : > { %v4626_v24 = vadd.f32 %v2901_v22, %v2900_v17 }
 0x301   : > { %v1588_v32 = vadd.f32 1e-06, %v2861_v29  ;;  %v2862_v36 = vpop.f32.mrb[60].mxu1  ;;  %v2903_v29 = vpop.f32.mrb[66].mxu0 }
 0x302   : > { %v2863_v40 = vpop.f32.mrb[61].mxu1 }
 0x303   : > { %v2864_v43 = vadd.f32 %v2863_v40, %v2862_v36  ;;  %1628 = vperm.xlu1 %3332, %v1588_v32   ;;  %v2904_v36 = vpop.f32.mrb[67].mxu0 }
 0x304   : > { %v4628_v40 = vadd.f32 %v2904_v36, %v2903_v29 }
 0x305   : > { %v1593_v46 = vadd.f32 1e-06, %v2864_v43  ;;  %v2865_v48 = vpop.f32.mrb[62].mxu1 }
 0x306   : > { %v2866_v51 = vpop.f32.mrb[63].mxu1 }
 0x307   : > { %v2867_v54 = vadd.f32 %v2866_v51, %v2865_v48  ;;  %1633 = vperm.xlu0 %3331, %v1593_v46   ;;  %v2906_v46 = vpop.f32.mrb[68].mxu0 }
 0x308   : > { %v2907_v49 = vpop.f32.mrb[69].mxu0 }
 0x309   : > { %v1598_v38 = vadd.f32 1e-06, %v2867_v54  ;;  %v2956_v44 = vpop.f32.mrb[64].mxu1  ;;  %v4630_v52 = vadd.f32 %v2907_v49, %v2906_v46 }
 0x30a   : > { %v2957_v50 = vpop.f32.mrb[65].mxu1 }
 0x30b   : > { %v2958_v31 = vadd.f32 %v2957_v50, %v2956_v44  ;;  %1638 = vperm.xlu1 %3332, %v1598_v38   ;;  %v2909_v44 = vpop.f32.mrb[70].mxu0 }
 0x30c   : > { %v2910_v50 = vpop.f32.mrb[71].mxu0 }
 0x30d   : > { %v1885_v57 = vadd.f32 1e-06, %v2958_v31  ;;  %v2959_v58 = vpop.f32.mrb[66].mxu1  ;;  %v4632_v31 = vadd.f32 %v2910_v50, %v2909_v44  ;;  %v2912_v59 = vpop.f32.mrb[72].mxu0 }
 0x30e   : > { %v2960_v60 = vpop.f32.mrb[67].mxu1  ;;  %v2913_v62 = vpop.f32.mrb[73].mxu0 }
 0x30f   : > { %v2961_v63 = vadd.f32 %v2960_v60, %v2959_v58  ;;  %1925 = vperm.xlu0 %3331, %v1885_v57   ;;  %v2915_v7 = vpop.f32.mrb[74].mxu0 }
 0x311   : > { %v1890_v4 = vadd.f32 1e-06, %v2961_v63  ;;  %v2962_v5 = vpop.f32.mrb[68].mxu1 }
 0x312   : > { %v2963_v33 = vpop.f32.mrb[69].mxu1 }
 0x313   : > { %v2964_v11 = vadd.f32 %v2963_v33, %v2962_v5  ;;  %1930 = vperm.xlu1 %3332, %v1890_v4   ;;  %v4634_v4 = vadd.f32 %v2913_v62, %v2912_v59  ;;  %v2916_v33 = vpop.f32.mrb[75].mxu0 }
 0x314   : > { %v4636_v9 = vadd.f32 %v2916_v33, %v2915_v7 }
 0x315   : > { %v1895_v14 = vadd.f32 1e-06, %v2964_v11  ;;  %v2965_v16 = vpop.f32.mrb[70].mxu1  ;;  %v2918_v11 = vpop.f32.mrb[76].mxu0 }
 0x316   : > { %v2966_v20 = vpop.f32.mrb[71].mxu1 }
 0x317   : > { %v2967_v23 = vadd.f32 %v2966_v20, %v2965_v16  ;;  %1935 = vperm.xlu0 %3331, %v1895_v14   ;;  %v2919_v16 = vpop.f32.mrb[77].mxu0 }
 0x318   : > { %v4638_v17 = vadd.f32 %v2919_v16, %v2918_v11  ;;  %v2921_v20 = vpop.f32.mrb[78].mxu0 }
 0x319   : > { %v1900_v25 = vadd.f32 1e-06, %v2967_v23  ;;  %v2968_v27 = vpop.f32.mrb[72].mxu1  ;;  %v2922_v23 = vpop.f32.mrb[79].mxu0 }
 0x31a   : > { %v2969_v32 = vpop.f32.mrb[73].mxu1 }
 0x31b   : > { %v2970_v37 = vadd.f32 %v2969_v32, %v2968_v27  ;;  %1940 = vperm.xlu1 %3332, %v1900_v25   ;;  %v4640_v25 = vadd.f32 %v2922_v23, %v2921_v20 }
 0x31d   : > { %v1905_v42 = vadd.f32 1e-06, %v2970_v37  ;;  %v2971_v43 = vpop.f32.mrb[74].mxu1 }
 0x31e   : > { %v2972_v48 = vpop.f32.mrb[75].mxu1 }
 0x31f   : > { %v2973_v51 = vadd.f32 %v2972_v48, %v2971_v43  ;;  %1945 = vperm.xlu0 %3331, %v1905_v42  }
 0x321   : > { %v1910_v54 = vadd.f32 1e-06, %v2973_v51  ;;  %v2974_v38 = vpop.f32.mrb[76].mxu1 }
 0x322   : > { %v2975_v47 = vpop.f32.mrb[77].mxu1 }
 0x323   : > { %v2976_v53 = vadd.f32 %v2975_v47, %v2974_v38  ;;  %1950 = vperm.xlu1 %3332, %v1910_v54  }
 0x325   : > { %v1915_v57 = vadd.f32 1e-06, %v2976_v53  ;;  %v2977_v58 = vpop.f32.mrb[78].mxu1 }
 0x326   : > { %v2978_v60 = vpop.f32.mrb[79].mxu1 }
 0x327   : > { %v2979_v63 = vadd.f32 %v2978_v60, %v2977_v58  ;;  %1955 = vperm.xlu0 %3331, %v1915_v57  }
 0x329   : > { %v1920_v5 = vadd.f32 1e-06, %v2979_v63 }
 0x32b   : > { %1960 = vperm.xlu1 %3332, %v1920_v5  }
 0x32e   : > { %v960_v14 = vpop.permute.xlu0 %959 }
 0x32f   : > { %3333 = vrcp.f32 %v960_v14 }
 0x332   : > { %v965_v22 = vpop.permute.xlu1 %964 }
 0x333   : > { %3335 = vrcp.f32 %v965_v22 }
 0x336   : > { %v970_v27 = vpop.permute.xlu0 %969 }
 0x337   : > { %3337 = vrcp.f32 %v970_v27 }
 0x339   : > { %v3334_v29 = vpop.eup %3333 }
 0x33a   : > { %v975_v32 = vpop.permute.xlu1 %974  ;;  %v4643_v36 = vmul.f32 %v3334_v29, %v4578_v0 }
 0x33b   : > { %3339 = vrcp.f32 %v975_v32 }
 0x33d   : > { %v3336_v37 = vpop.eup %3335 }
 0x33e   : > { %v980_v42 = vpop.permute.xlu0 %979  ;;  %v4646_v43 = vmul.f32 %v3336_v37, %v4580_v3 }
 0x33f   : > { %3341 = vrcp.f32 %v980_v42 }
 0x341   : > { %v3338_v46 = vpop.eup %3337 }
 0x342   : > { %v985_v48 = vpop.permute.xlu1 %984  ;;  %v4649_v49 = vmul.f32 %v3338_v46, %v4582_v6 }
 0x343   : > { %3343 = vrcp.f32 %v985_v48 }
 0x345   : > { %v3340_v51 = vpop.eup %3339 }
 0x346   : > { %v990_v54 = vpop.permute.xlu0 %989  ;;  %v4652_v38 = vmul.f32 %v3340_v51, %v4584_v8 }
 0x347   : > { %3345 = vrcp.f32 %v990_v54 }
 0x349   : > { %v3342_v0 = vpop.eup %3341 }
 0x34a   : > { %v995_v44 = vpop.permute.xlu1 %994  ;;  %v4655_v47 = vmul.f32 %v3342_v0, %v4586_v34 }
 0x34b   : > { %3347 = vrcp.f32 %v995_v44 }
 0x34d   : > { %v3344_v3 = vpop.eup %3343 }
 0x34e   : > { %v1282_v50 = vpop.permute.xlu0 %1281  ;;  %v4658_v53 = vmul.f32 %v3344_v3, %v4588_v12 }
 0x34f   : > { %3349 = vrcp.f32 %v1282_v50 }
 0x351   : > { %v3346_v6 = vpop.eup %3345 }
 0x352   : > { %v1287_v57 = vpop.permute.xlu1 %1286  ;;  %v4661_v58 = vmul.f32 %v3346_v6, %v4590_v15 }
 0x353   : > { %3351 = vrcp.f32 %v1287_v57 }
 0x355   : > { %v3348_v8 = vpop.eup %3347 }
 0x356   : > { %v1292_v59 = vpop.permute.xlu0 %1291  ;;  %v4664_v60 = vmul.f32 %v3348_v8, %v4592_v18 }
 0x357   : > { %3353 = vrcp.f32 %v1292_v59 }
 0x359   : > { %v3350_v34 = vpop.eup %3349 }
 0x35a   : > { %v1320_v62 = vmul.f32 %v3350_v34, %v4594_v10  ;;  %v1297_v63 = vpop.permute.xlu1 %1296 }
 0x35b   : > { %3355 = vrcp.f32 %v1297_v63 }
 0x35c   : > { %1987 = vrot.lane.b32.xlu0 %v1320_v62, %s3464_s10 }
 0x35d   : > { %v3352_v12 = vpop.eup %3351 }
 0x35e   : > { %v1322_v5 = vmul.f32 %v3352_v12, %v4596_v19  ;;  %v1302_v15 = vpop.permute.xlu0 %1301 }
 0x35f   : > { %3357 = vrcp.f32 %v1302_v15 }
 0x360   : > { %1989 = vrot.lane.b32.xlu1 %v1322_v5, %s3464_s10 }
 0x361   : > { %v3354_v7 = vpop.eup %3353 }
 0x362   : > { %v1324_v18 = vmul.f32 %v3354_v7, %v4598_v26  ;;  %v1307_v33 = vpop.permute.xlu1 %1306 }
 0x363   : > { %3359 = vrcp.f32 %v1307_v33 }
 0x364   : > { %1991 = vrot.lane.b32.xlu0 %v1324_v18, %s3464_s10 }
 0x365   : > { %v3356_v10 = vpop.eup %3355 }
 0x366   : > { %v1326_v11 = vmul.f32 %v3356_v10, %v4600_v39  ;;  %v1312_v14 = vpop.permute.xlu0 %1311 }
 0x367   : > { %3361 = vrcp.f32 %v1312_v14 }
 0x368   : > { %1993 = vrot.lane.b32.xlu1 %v1326_v11, %s3464_s10 }
 0x369   : > { %v3358_v16 = vpop.eup %3357 }
 0x36a   : > { %v1328_v19 = vmul.f32 %v3358_v16, %v4602_v28  ;;  %v1317_v20 = vpop.permute.xlu1 %1316 }
 0x36b   : > { %3363 = vrcp.f32 %v1317_v20 }
 0x36c   : > { %1995 = vrot.lane.b32.xlu0 %v1328_v19, %s3464_s10 }
 0x36d   : > { %v3360_v22 = vpop.eup %3359 }
 0x36e   : > { %v1330_v26 = vmul.f32 %v3360_v22, %v4604_v41  ;;  %v1604_v23 = vpop.permute.xlu0 %1603 }
 0x36f   : > { %3365 = vrcp.f32 %v1604_v23 }
 0x370   : > { %1997 = vrot.lane.b32.xlu1 %v1330_v26, %s3464_s10 }
 0x371   : > { %v3362_v27 = vpop.eup %3361 }
 0x372   : > { %v1332_v39 = vmul.f32 %v3362_v27, %v4606_v35  ;;  %v1609_v29 = vpop.permute.xlu1 %1608 }
 0x373   : > { %3367 = vrcp.f32 %v1609_v29 }
 0x374   : > { %1999 = vrot.lane.b32.xlu0 %v1332_v39, %s3464_s10 }
 0x375   : > { %v3364_v32 = vpop.eup %3363 }
 0x376   : > { %v1334_v28 = vmul.f32 %v3364_v32, %v4608_v1  ;;  %v1614_v37 = vpop.permute.xlu0 %1613 }
 0x377   : > { %3369 = vrcp.f32 %v1614_v37 }
 0x378   : > { %2001 = vrot.lane.b32.xlu1 %v1334_v28, %s3464_s10 }
 0x379   : > { %v3366_v42 = vpop.eup %3365 }
 0x37a   : > { %v1642_v41 = vmul.f32 %v3366_v42, %v4610_v61  ;;  %v1619_v46 = vpop.permute.xlu1 %1618 }
 0x37b   : > { %3371 = vrcp.f32 %v1619_v46 }
 0x37c   : > { %2019 = vrot.lane.b32.xlu0 %v1642_v41, %s3465_s11 }
 0x37d   : > { %v3368_v35 = vpop.eup %3367 }
 0x37e   : > { %v1644_v48 = vmul.f32 %v3368_v35, %v4612_v21  ;;  %v1624_v51 = vpop.permute.xlu0 %1623 }
 0x37f   : > { %3373 = vrcp.f32 %v1624_v51 }
 0x380   : > { %2021 = vrot.lane.b32.xlu1 %v1644_v48, %s3465_s11 }
 0x381   : > { %v3370_v1 = vpop.eup %3369 }
 0x382   : > { %v1646_v54 = vmul.f32 %v3370_v1, %v4614_v30  ;;  %v1629_v0 = vpop.permute.xlu1 %1628 }
 0x383   : > { %3375 = vrcp.f32 %v1629_v0 }
 0x384   : > { %2023 = vrot.lane.b32.xlu0 %v1646_v54, %s3465_s11 }
 0x385   : > { %v3372_v61 = vpop.eup %3371 }
 0x386   : > { %v1648_v44 = vmul.f32 %v3372_v61, %v4616_v45  ;;  %v1634_v3 = vpop.permute.xlu0 %1633 }
 0x387   : > { %3377 = vrcp.f32 %v1634_v3 }
 0x388   : > { %2025 = vrot.lane.b32.xlu1 %v1648_v44, %s3465_s11 }
 0x389   : > { %v3374_v50 = vpop.eup %3373 }
 0x38a   : > { %v1650_v21 = vmul.f32 %v3374_v50, %v4618_v55  ;;  %v1639_v6 = vpop.permute.xlu1 %1638 }
 0x38b   : > { %3379 = vrcp.f32 %v1639_v6 }
 0x38c   : > { %2027 = vrot.lane.b32.xlu0 %v1650_v21, %s3465_s11 }
 0x38d   : > { %v3376_v57 = vpop.eup %3375 }
 0x38e   : > { %v1652_v30 = vmul.f32 %v3376_v57, %v4620_v56  ;;  %v1926_v8 = vpop.permute.xlu0 %1925 }
 0x38f   : > { %3381 = vrcp.f32 %v1926_v8 }
 0x390   : > { %2029 = vrot.lane.b32.xlu1 %v1652_v30, %s3465_s11 }
 0x391   : > { %v3378_v59 = vpop.eup %3377 }
 0x392   : > { %v1654_v45 = vmul.f32 %v3378_v59, %v4622_v2  ;;  %v1931_v34 = vpop.permute.xlu1 %1930 }
 0x393   : > { %3383 = vrcp.f32 %v1931_v34 }
 0x394   : > { %2031 = vrot.lane.b32.xlu0 %v1654_v45, %s3465_s11 }
 0x395   : > { %v3380_v62 = vpop.eup %3379 }
 0x396   : > { %v1656_v55 = vmul.f32 %v3380_v62, %v4624_v13  ;;  %v1936_v63 = vpop.permute.xlu0 %1935 }
 0x397   : > { %3385 = vrcp.f32 %v1936_v63 }
 0x398   : > { %2033 = vrot.lane.b32.xlu1 %v1656_v55, %s3465_s11 }
 0x399   : > { %v3382_v12 = vpop.eup %3381 }
 0x39a   : > { %v1964_v56 = vmul.f32 %v3382_v12, %v4626_v24  ;;  %v1941_v5 = vpop.permute.xlu1 %1940 }
 0x39b   : > { %3387 = vrcp.f32 %v1941_v5 }
 0x39c   : > { %2051 = vrot.lane.b32.xlu0 %v1964_v56, %s3466_s17 }
 0x39d   : > { %v3384_v15 = vpop.eup %3383 }
 0x39e   : > { %v1966_v2 = vmul.f32 %v3384_v15, %v4628_v40  ;;  %v1946_v7 = vpop.permute.xlu0 %1945 }
 0x39f   : > { %3389 = vrcp.f32 %v1946_v7 }
 0x3a0   : > { %2053 = vrot.lane.b32.xlu1 %v1966_v2, %s3466_s17 }
 0x3a1   : > { %v3386_v18 = vpop.eup %3385 }
 0x3a2   : > { %v1968_v13 = vmul.f32 %v3386_v18, %v4630_v52  ;;  %v1951_v33 = vpop.permute.xlu1 %1950 }
 0x3a3   : > { %3391 = vrcp.f32 %v1951_v33 }
 0x3a4   : > { %2055 = vrot.lane.b32.xlu0 %v1968_v13, %s3466_s17 }
 0x3a5   : > { %v3388_v10 = vpop.eup %3387 }
 0x3a6   : > { %v1970_v11 = vmul.f32 %v3388_v10, %v4632_v31  ;;  %v1956_v24 = vpop.permute.xlu0 %1955 }
 0x3a7   : > { %3393 = vrcp.f32 %v1956_v24 }
 0x3a8   : > { %2057 = vrot.lane.b32.xlu1 %v1970_v11, %s3466_s17 }
 0x3a9   : > { %v3390_v14 = vpop.eup %3389 }
 0x3aa   : > { %v1972_v16 = vmul.f32 %v3390_v14, %v4634_v4  ;;  %v1961_v19 = vpop.permute.xlu1 %1960 }
 0x3ab   : > { %3395 = vrcp.f32 %v1961_v19 }
 0x3ac   : > { %2059 = vrot.lane.b32.xlu0 %v1972_v16, %s3466_s17 }
 0x3ad   : > { %v3392_v40 = vpop.eup %3391 }
 0x3ae   : > { %v1974_v20 = vmul.f32 %v3392_v40, %v4636_v9 }
 0x3b0   : > { %2061 = vrot.lane.b32.xlu1 %v1974_v20, %s3466_s17 }
 0x3b1   : > { %v3394_v52 = vpop.eup %3393 }
 0x3b2   : > { %v1976_v22 = vmul.f32 %v3394_v52, %v4638_v17 }
 0x3b4   : > { %2063 = vrot.lane.b32.xlu0 %v1976_v22, %s3466_s17 }
 0x3b5   : > { %v3396_v26 = vpop.eup %3395 }
 0x3b6   : > { %v1978_v31 = vmul.f32 %v3396_v26, %v4640_v25 }
 0x3b8   : > { %2065 = vrot.lane.b32.xlu1 %v1978_v31, %s3466_s17 }
 0x3ce   : > { %v1988_v23 = vpop.permute.xlu0 %1987 }
 0x3cf   : > { %v2076_v25 = vsel %vm2075_vm1, %v4643_v36, %v1988_v23 }
 0x3d2   : > { %v1990_v27 = vpop.permute.xlu1 %1989 }
 0x3d3   : > { %v2077_v61 = vsel %vm2075_vm1, %v4646_v43, %v1990_v27 }
 0x3d6   : > { %v1992_v4 = vpop.permute.xlu0 %1991 }
 0x3d7   : > { %v2078_v50 = vsel %vm2075_vm1, %v4649_v49, %v1992_v4 }
 0x3da   : > { %v1994_v39 = vpop.permute.xlu1 %1993 }
 0x3db   : > { %v2079_v43 = vsel %vm2075_vm1, %v4652_v38, %v1994_v39 }
 0x3de   : > { %v1996_v29 = vpop.permute.xlu0 %1995 }
 0x3df   : > { %v2080_v49 = vsel %vm2075_vm1, %v4655_v47, %v1996_v29 }
 0x3e2   : > { %v1998_v32 = vpop.permute.xlu1 %1997 }
 0x3e3   : > { %v2081_v38 = vsel %vm2075_vm1, %v4658_v53, %v1998_v32 }
 0x3e6   : > { %v2000_v28 = vpop.permute.xlu0 %1999 }
 0x3e7   : > { %v2082_v47 = vsel %vm2075_vm1, %v4661_v58, %v2000_v28 }
 0x3ea   : > { %v2002_v37 = vpop.permute.xlu1 %2001 }
 0x3eb   : > { %v2083_v53 = vsel %vm2075_vm1, %v4664_v60, %v2002_v37 }
 0x3ee   : > { %v2020_v9 = vpop.permute.xlu0 %2019 }
 0x3ef   : > { %v2085_v51 = vsel %vm2084_vm11, %v2076_v25, %v2020_v9 }
 0x3f2   : > { %v2022_v42 = vpop.permute.xlu1 %2021 }
 0x3f3   : > { %v2086_v44 = vsel %vm2084_vm11, %v2077_v61, %v2022_v42 }
 0x3f6   : > { %v2024_v41 = vpop.permute.xlu0 %2023 }
 0x3f7   : > { %v2087_v21 = vsel %vm2084_vm11, %v2078_v50, %v2024_v41 }
 0x3fa   : > { %v2026_v46 = vpop.permute.xlu1 %2025 }
 0x3fb   : > { %v2088_v30 = vsel %vm2084_vm11, %v2079_v43, %v2026_v46 }
 0x3fe   : > { %v2028_v17 = vpop.permute.xlu0 %2027 }
 0x3ff   : > { %v2089_v45 = vsel %vm2084_vm11, %v2080_v49, %v2028_v17 }
 0x402   : > { %v2030_v35 = vpop.permute.xlu1 %2029 }
 0x403   : > { %v2090_v55 = vsel %vm2084_vm11, %v2081_v38, %v2030_v35 }
 0x406   : > { %v2032_v48 = vpop.permute.xlu0 %2031 }
 0x407   : > { %v2091_v56 = vsel %vm2084_vm11, %v2082_v47, %v2032_v48 }
 0x40a   : > { %v2034_v1 = vpop.permute.xlu1 %2033 }
 0x40b   : > { %v2092_v58 = vsel %vm2084_vm11, %v2083_v53, %v2034_v1 }
 0x40e   : > { %v2052_v54 = vpop.permute.xlu0 %2051 }
 0x40f   : > { %v2094_v0 = vsel %vm2093_vm14, %v2085_v51, %v2052_v54 }
 0x410   : > { %2102 = vst [vmem:[%s4713_s24] sm:$0xff] %v2094_v0 }
 0x412   : > { %v2054_v3 = vpop.permute.xlu1 %2053 }
 0x413   : > { %v2095_v36 = vsel %vm2093_vm14, %v2086_v44, %v2054_v3 }
 0x414   : > { %2103 = vst [vmem:[%s4713_s24 + $0x8] sm:$0xff] %v2095_v36 }
 0x416   : > { %v2056_v6 = vpop.permute.xlu0 %2055 }
 0x417   : > { %v2096_v57 = vsel %vm2093_vm14, %v2087_v21, %v2056_v6 }
 0x418   : > { %2104 = vst [vmem:[%s4713_s24 + $0x10] sm:$0xff] %v2096_v57 }
 0x41a   : > { %v2058_v8 = vpop.permute.xlu1 %2057 }
 0x41b   : > { %v2097_v59 = vsel %vm2093_vm14, %v2088_v30, %v2058_v8 }
 0x41c   : > { %2105 = vst [vmem:[%s4713_s24 + $0x18] sm:$0xff] %v2097_v59 }
 0x41e   : > { %v2060_v34 = vpop.permute.xlu0 %2059 }
 0x41f   : > { %v2098_v62 = vsel %vm2093_vm14, %v2089_v45, %v2060_v34 }
 0x420   : > { %2106 = vst [vmem:[%s4713_s24 + $0x20] sm:$0xff] %v2098_v62 }
 0x422   : > { %v2062_v63 = vpop.permute.xlu1 %2061 }
 0x423   : > { %v2099_v12 = vsel %vm2093_vm14, %v2090_v55, %v2062_v63 }
 0x424   : > { %2107 = vst [vmem:[%s4713_s24 + $0x28] sm:$0xff] %v2099_v12 }
 0x426   : > { %v2064_v5 = vpop.permute.xlu0 %2063 }
 0x427   : > { %v2100_v15 = vsel %vm2093_vm14, %v2091_v56, %v2064_v5 }
 0x428   : > { %2108 = vst [vmem:[%s4713_s24 + $0x30] sm:$0xff] %v2100_v15 }
 0x42a   : > { %v2066_v2 = vpop.permute.xlu1 %2065 }
 0x42b   : > { %v2101_v7 = vsel %vm2093_vm14, %v2092_v58, %v2066_v2 }
 0x42c   : > { %2109 = vst [vmem:[%s4713_s24 + $0x38] sm:$0xff] %v2101_v7 }
 0x42d   : > { %3410 = shalt.err (!%p3407_p3)
}
 0x42e   : > { %s3411_s7 = scalar_lea.hbm %s4753_s29, 1024  ;;  %s3415_s10 = scalar_lea.hbm %s4806_s3, 2048 }
 0x42f   : > { %p3412_p4 = scmp.ne.s32.totalorder %s4753_s29, %s3411_s7  ;;  %p3416_p9 = scmp.lt.u32.totalorder %s4753_s29, %s4806_s3 }
 0x430   : > { %p3417_p10 = scmp.lt.u32.totalorder %s3415_s10, %s3411_s7  ;;  %p3419_p12 = scmp.lt.u32.totalorder %s3411_s7, %s4753_s29 }
 0x431   : > { %p3413_p7 = pnand %p3412_p4, %p3528_p5 }
 0x432   : > { %p3418_p11 = por %p3417_p10, %p3416_p9 }
 0x433   : > { %p3414_p8 = pneg %p3413_p7 }
 0x434   : > { %p3420_p13 = por %p3419_p12, %p3418_p11 }
 0x436   : > { %p3421_p0 = pnand %p3420_p13, %p3414_p8 }
 0x438   : > { %3424 = shalt.err (!%p3421_p0)
}
 0x439   : > { %s3468_s19 = smov 128   ;;  %s3469_s20 = smov 8  }
 0x43a   : > { %3284 = dma.vmem_to_hbm [thread:$0]  (%p3528_p5), %s4755_s26, 1024, %s4753_s29, %s4762_s16, %s3468_s19, %s3468_s19, %s3469_s20  }
 0x43b PF: > { %p3290_p1 = scmp.ge.s32.totalorder %s3459_s15, 2  ;;  %s2139_s24 = sand.u32 1, %s3447_s12  }
 0x43c   : > { %s2140_s25 = scalar_lea.sflag [#allocation3], %s2139_s24 }
 0x43d   : > { %p3287_p2 = pnand %p3290_p1, %p3532_p6 }
 0x43f   : > { %3442 = dma.done.wait (!%p3287_p2), %s2140_s25, 1024  }
 0x440   : > { %3444 = vsyncadd (!%p3287_p2), %s2140_s25, 4294966272  ;;  %p13_p3 = scmp.ge.s32.totalorder %s3515_s18, 4   ;;  %s4881_s12 = smov %s3451_s13 }
 0x441   : > { %s4882_s13 = smov %s3455_s14  ;;  %s4883_s14 = smov %s3526_s21 }
 0x442   : > { %s4884_s15 = smov %s3515_s18  ;;  %15 = sbr.rel (!%p13_p3) target bundleno = 3 (0x3), region = 73 }
 0x449   :  { %2145 = vsyncpa [#allocation3], 1 }
 0x44a   :  { %2147 = vsyncpa [#allocation3 + $0x1], 1 }

</bundles_post_ra>
